<compile_context>
chip_gen: v5e
topology: v5e:2x2
jax: 0.10.0
libtpu: 0.0.40
codegen_flags: <defaults>
</compile_context>

<pallas_src>
import functools

import jax
import jax.numpy as jnp
from jax.experimental import pallas as pl
from jax.experimental.pallas import tpu as pltpu


def _fused_layers_kernel(x_hbm, g1_ref, be1_ref, wqkv_ref, wout_ref, bout_ref,
                         g2_ref, be2_ref, w1_ref, b1_ref, w2_ref, b2_ref,
                         o_ref, *, batch_tile, seq, heads, dim_head):
    """One grid step == one transformer layer on one (batch_tile*seq, D) row tile."""
    eps = jnp.float32(1e-5)                       # torch.nn.LayerNorm default eps
    b = pl.program_id(0)                          # batch-tile index   (parallel)
    d = pl.program_id(1)                          # layer index        (arbitrary)
    rows = batch_tile * seq
    inner = heads * dim_head
    G = batch_tile * heads

    # One-time load of this row tile's input into the resident output block.
    @pl.when(d == 0)
    def _():
        start = pl.multiple_of(b * rows, rows)
        pltpu.sync_copy(x_hbm.at[pl.ds(start, rows), :], o_ref)

    x = o_ref[...]                                # (rows, D) f32 residual stream

    def layernorm(t, g, be):
        mu = jnp.mean(t, axis=-1, keepdims=True)
        var = jnp.mean((t - mu) ** 2, axis=-1, keepdims=True)
        return (t - mu) * jax.lax.rsqrt(var + eps) * g + be

    # ---------------- PreNorm + MultiHeadAttention, residual ----------------
    xn = layernorm(x, g1_ref[0], be1_ref[0])                        # (rows, D) f32

    # Fused lane-dense QKV matmul; 1/sqrt(dim_head) pre-folded into the Q columns.
    qkv = jnp.dot(xn.astype(jnp.bfloat16), wqkv_ref[0],
                  preferred_element_type=jnp.float32)               # (rows, 3*inner)

    def split_heads(t):                           # (rows, inner) -> (B*heads, N, dh)
        t = t.reshape(batch_tile, seq, heads, dim_head)
        t = jnp.transpose(t, (0, 2, 1, 3))        # single relayout, done in f32
        return t.reshape(G, seq, dim_head).astype(jnp.bfloat16)

    qh = split_heads(qkv[:, 0 * inner:1 * inner])
    kh = split_heads(qkv[:, 1 * inner:2 * inner])
    vh = split_heads(qkv[:, 2 * inner:3 * inner])

    dots = jnp.einsum('gnd,gmd->gnm', qh, kh,
                      preferred_element_type=jnp.float32)           # (G, N, N) f32
    dots = dots - jnp.max(dots, axis=-1, keepdims=True)
    e = jnp.exp(dots)
    attn = e * pl.reciprocal(jnp.sum(e, axis=-1, keepdims=True), approx=True)
    ctx = jnp.einsum('gnm,gmd->gnd', attn.astype(jnp.bfloat16), vh,
                     preferred_element_type=jnp.float32)            # (G, N, dh) f32

    # Re-layout to (rows, inner) so the out-projection is one K=inner matmul
    # (algebraically identical to concat(heads) @ W_out in the reference).
    ctx = ctx.reshape(batch_tile, heads, seq, dim_head)
    ctx = jnp.transpose(ctx, (0, 2, 1, 3)).reshape(rows, inner)

    attn_out = jnp.dot(ctx.astype(jnp.bfloat16), wout_ref[0],
                       preferred_element_type=jnp.float32) + bout_ref[0]
    x = x + attn_out                                                # residual 1

    # ---------------- PreNorm + FeedForward (GELU), residual ----------------
    xn2 = layernorm(x, g2_ref[0], be2_ref[0])
    h1 = jnp.dot(xn2.astype(jnp.bfloat16), w1_ref[0],
                 preferred_element_type=jnp.float32) + b1_ref[0]
    # exact GELU (torch.nn.GELU default): 0.5 * x * (1 + erf(x / sqrt(2)))
    h1 = 0.5 * h1 * (1.0 + jax.lax.erf(h1 * jnp.float32(0.7071067811865476)))
    h2 = jnp.dot(h1.astype(jnp.bfloat16), w2_ref[0],
                 preferred_element_type=jnp.float32) + b2_ref[0]

    o_ref[...] = x + h2                           # stays resident in VMEM across depth


def _pick_batch_tile(B, N, target_rows=256):
    """Batch-aligned row tile: bounds VMEM, keeps >=2 tiles for megacore when B>=2."""
    bt = max(1, min(B, target_rows // max(N, 1)))
    while B % bt:
        bt -= 1
    if B >= 2 and B // bt < 2:
        bt = max(1, B // 2)
        while B % bt:
            bt -= 1
    return bt


def _vmem_bytes_estimate(rows, D, inner, mlp, heads, N, bt):
    """Rough per-step VMEM working set (bytes), used to set vmem_limit_bytes."""
    w_bf16 = D * 3 * inner + inner * D + D * mlp + mlp * D          # layer weights
    vec_f32 = 6 * D + mlp                                           # LN/bias vectors
    G = bt * heads
    act_f32 = (rows * 3 * inner + 3 * rows * inner + 3 * G * N * N
               + rows * inner + 2 * rows * mlp + 4 * rows * D)
    return (2 * 2 * w_bf16            # bf16 weights, double-buffered
            + 2 * 4 * vec_f32
            + 2 * 4 * rows * D        # resident output block
            + 4 * act_f32)            # f32 intermediates (upper bound)


def transformer_forward(x, params, *, heads, dim_head, batch_tile=None):
    """x: (B, N, D) f32.  params: dict of depth-stacked weights (see init_params)."""
    B, N, D = x.shape
    depth = params["wqkv"].shape[0]
    inner = heads * dim_head
    mlp_dim = params["w1"].shape[-1]

    if batch_tile is None:
        batch_tile = _pick_batch_tile(B, N)
    assert B % batch_tile == 0
    n_btiles = B // batch_tile
    rows = batch_tile * N
    M = B * N

    x2 = x.reshape(M, D).astype(jnp.float32)

    kernel = functools.partial(_fused_layers_kernel, batch_tile=batch_tile,
                               seq=N, heads=heads, dim_head=dim_head)

    def wspec(arr):
        nd = arr.ndim
        # Stream one layer's weights per depth step; block = full trailing dims.
        return pl.BlockSpec((1,) + arr.shape[1:],
                            lambda b, d, _n=nd: (d,) + (0,) * (_n - 1))

    est = _vmem_bytes_estimate(rows, D, inner, mlp_dim, heads, N, batch_tile)
    vmem_limit = int(min(max(2 * est, 32 * 1024 * 1024), 64 * 1024 * 1024))

    # NOTE: for very large D / mlp_dim, the next step would be K-tiling the FFN
    # weights with an inner pltpu.emit_pipeline; whole-layer streaming is fine here.
    out = pl.pallas_call(
        kernel,
        out_shape=jax.ShapeDtypeStruct((M, D), jnp.float32),
        grid=(n_btiles, depth),
        in_specs=[
            pl.BlockSpec(memory_space=pl.ANY),                 # x: raw HBM, copied once
            wspec(params["g1"]), wspec(params["be1"]),         # LN1 gamma/beta
            wspec(params["wqkv"]),                             # fused QKV weight (bf16)
            wspec(params["wout"]), wspec(params["bout"]),      # attention out-proj
            wspec(params["g2"]), wspec(params["be2"]),         # LN2 gamma/beta
            wspec(params["w1"]), wspec(params["b1"]),          # MLP up
            wspec(params["w2"]), wspec(params["b2"]),          # MLP down
        ],
        out_specs=pl.BlockSpec((rows, D), lambda b, d: (b, 0)),  # resident across depth
        compiler_params=pltpu.CompilerParams(
            dimension_semantics=("parallel", "arbitrary"),       # batch tiles || depth
            vmem_limit_bytes=vmem_limit),
    )(x2, params["g1"], params["be1"], params["wqkv"], params["wout"], params["bout"],
      params["g2"], params["be2"], params["w1"], params["b1"], params["w2"], params["b2"])
    return out.reshape(B, N, D)


def init_params(key, depth, dim, heads, dim_head, mlp_dim):
    """Depth-stacked parameters. QKV weight is a single (dim, 3*inner) matrix whose
    columns are [Q | K | V], each group packed head-major (h, d) like nn.Linear's
    to_qkv (transposed from torch's (out, in)); the attention scale is folded into
    the Q columns.  Matmul weights are stored in bf16, LN/bias vectors in f32."""
    inner = heads * dim_head
    scale = dim_head ** -0.5
    names = ["g1", "be1", "wqkv", "wout", "bout", "g2", "be2", "w1", "b1", "w2", "b2"]
    per = {n: [] for n in names}

    for _ in range(depth):
        key, *ks = jax.random.split(key, 6)
        wqkv = 0.02 * jax.random.normal(ks[0], (dim, 3 * inner), jnp.float32)
        wqkv = wqkv.at[:, :inner].multiply(scale)          # fold 1/sqrt(dim_head) into Q
        wout = 0.02 * jax.random.normal(ks[1], (inner, dim), jnp.float32)
        per["g1"].append(jnp.ones((1, dim), jnp.float32))  # LayerNorm defaults
        per["be1"].append(jnp.zeros((1, dim), jnp.float32))
        per["wqkv"].append(wqkv.astype(jnp.bfloat16))
        per["wout"].append(wout.astype(jnp.bfloat16))
        per["bout"].append(jnp.zeros((1, dim), jnp.float32))
        per["g2"].append(jnp.ones((1, dim), jnp.float32))
        per["be2"].append(jnp.zeros((1, dim), jnp.float32))
        per["w1"].append((0.02 * jax.random.normal(ks[2], (dim, mlp_dim),
                                                   jnp.float32)).astype(jnp.bfloat16))
        per["b1"].append(0.02 * jax.random.normal(ks[3], (1, mlp_dim), jnp.float32))
        per["w2"].append((0.02 * jax.random.normal(ks[4], (mlp_dim, dim),
                                                   jnp.float32)).astype(jnp.bfloat16))
        per["b2"].append(jnp.zeros((1, dim), jnp.float32))
    return {n: jnp.stack(v, axis=0) for n, v in per.items()}


if __name__ == "__main__":
    # Small shapes consistent with the module's (b, n, dim) forward; D, inner and
    # mlp_dim chosen as multiples of 128 so all matmul outputs are lane-dense.
    B, N, D = 2, 16, 128
    depth, heads, dim_head, mlp_dim = 2, 4, 32, 256    # inner_dim = 128, project_out=True

    key = jax.random.PRNGKey(0)
    kx, kp = jax.random.split(key)
    x = jax.random.normal(kx, (B, N, D), jnp.float32)
    params = init_params(kp, depth, D, heads, dim_head, mlp_dim)

    fwd = jax.jit(functools.partial(transformer_forward, heads=heads, dim_head=dim_head))
    y = fwd(x, params)
    jax.block_until_ready(y)
    assert y.shape == (B, N, D) and y.dtype == jnp.float32
    print("KERNEL_OK")
</pallas_src>

<mosaic_0001>
module attributes {stable_mosaic.version = 11 : i64} {
  func.func @_fused_layers_kernel(%arg0: i32, %arg1: i32, %arg2: memref<32x128xf32, #tpu.memory_space<any>>, %arg3: memref<1x1x128xf32, #tpu.memory_space<vmem>>, %arg4: memref<1x1x128xf32, #tpu.memory_space<vmem>>, %arg5: memref<1x128x384xbf16, #tpu.memory_space<vmem>>, %arg6: memref<1x128x128xbf16, #tpu.memory_space<vmem>>, %arg7: memref<1x1x128xf32, #tpu.memory_space<vmem>>, %arg8: memref<1x1x128xf32, #tpu.memory_space<vmem>>, %arg9: memref<1x1x128xf32, #tpu.memory_space<vmem>>, %arg10: memref<1x128x256xbf16, #tpu.memory_space<vmem>>, %arg11: memref<1x1x256xf32, #tpu.memory_space<vmem>>, %arg12: memref<1x256x128xbf16, #tpu.memory_space<vmem>>, %arg13: memref<1x1x128xf32, #tpu.memory_space<vmem>>, %arg14: memref<16x128xf32, #tpu.memory_space<vmem>>) attributes {dimension_semantics = [#tpu.dimension_semantics<parallel>, #tpu.dimension_semantics<arbitrary>], iteration_bounds = array<i64: 2, 2>, scalar_prefetch = 0 : i64, scratch_operands = 0 : i64, tpu.core_type = #tpu.core_type<tc>, window_params = [{}, {transform_indices = @transform_1, window_bounds = array<i64: 1, 1, 128>}, {transform_indices = @transform_2, window_bounds = array<i64: 1, 1, 128>}, {transform_indices = @transform_3, window_bounds = array<i64: 1, 128, 384>}, {transform_indices = @transform_4, window_bounds = array<i64: 1, 128, 128>}, {transform_indices = @transform_5, window_bounds = array<i64: 1, 1, 128>}, {transform_indices = @transform_6, window_bounds = array<i64: 1, 1, 128>}, {transform_indices = @transform_7, window_bounds = array<i64: 1, 1, 128>}, {transform_indices = @transform_8, window_bounds = array<i64: 1, 128, 256>}, {transform_indices = @transform_9, window_bounds = array<i64: 1, 1, 256>}, {transform_indices = @transform_10, window_bounds = array<i64: 1, 256, 128>}, {transform_indices = @transform_11, window_bounds = array<i64: 1, 1, 128>}, {transform_indices = @transform_12, window_bounds = array<i64: 16, 128>}]} {
    %c0_i32 = arith.constant 0 : i32
    %0 = arith.cmpi eq, %arg1, %c0_i32 : i32
    %1 = arith.extui %0 : i1 to i32
    %c0_i32_0 = arith.constant 0 : i32
    %2 = arith.cmpi ne, %1, %c0_i32_0 : i32
    scf.if %2 {
      %c16_i32 = arith.constant 16 : i32
      %126 = arith.muli %arg0, %c16_i32 : i32
      %127 = tpu.assume_multiple %126, 16 : i32
      "tpu.region"() ({
        %128 = tpu.sem_alloc : memref<!tpu.dma_semaphore, #tpu.memory_space<semaphore_mem>>
        %c0_i32_57 = arith.constant 0 : i32
        %129 = tpu.memref_slice %arg2[%127, %c0_i32_57] : memref<32x128xf32, #tpu.memory_space<any>> -> memref<16x128xf32, #tpu.memory_space<any>>
        tpu.enqueue_dma source(%129 : memref<16x128xf32, #tpu.memory_space<any>>) target(%arg14 : memref<16x128xf32, #tpu.memory_space<vmem>>) target_semaphore(%128 : memref<!tpu.dma_semaphore, #tpu.memory_space<semaphore_mem>>)
        %c0_i32_58 = arith.constant 0 : i32
        %130 = tpu.memref_slice %arg2[%127, %c0_i32_58] : memref<32x128xf32, #tpu.memory_space<any>> -> memref<16x128xf32, #tpu.memory_space<any>>
        tpu.wait_dma2 semaphore(%128 : memref<!tpu.dma_semaphore, #tpu.memory_space<semaphore_mem>>) src(%130 : memref<16x128xf32, #tpu.memory_space<any>>) dst(%arg14 : memref<16x128xf32, #tpu.memory_space<vmem>>)
        tpu.yield
      }) : () -> ()
    } else {
    }
    %c0 = arith.constant 0 : index
    %c0_1 = arith.constant 0 : index
    %3 = vector.load %arg14[%c0, %c0_1] : memref<16x128xf32, #tpu.memory_space<vmem>>, vector<16x128xf32>
    %c0_2 = arith.constant 0 : index
    %c0_3 = arith.constant 0 : index
    %c0_4 = arith.constant 0 : index
    %4 = vector.load %arg3[%c0_2, %c0_3, %c0_4] : memref<1x1x128xf32, #tpu.memory_space<vmem>>, vector<1x1x128xf32>
    %5 = vector.shape_cast %4 : vector<1x1x128xf32> to vector<1x128xf32>
    %c0_5 = arith.constant 0 : index
    %c0_6 = arith.constant 0 : index
    %c0_7 = arith.constant 0 : index
    %6 = vector.load %arg4[%c0_5, %c0_6, %c0_7] : memref<1x1x128xf32, #tpu.memory_space<vmem>>, vector<1x1x128xf32>
    %7 = vector.shape_cast %6 : vector<1x1x128xf32> to vector<1x128xf32>
    %cst = arith.constant dense<0.000000e+00> : vector<16xf32>
    %8 = vector.multi_reduction <add>, %3, %cst [1] : vector<16x128xf32> to vector<16xf32>
    %9 = vector.shape_cast %8 : vector<16xf32> to vector<16x1xf32>
    %cst_8 = arith.constant 1.280000e+02 : f32
    %10 = vector.broadcast %cst_8 : f32 to vector<16x1xf32>
    %11 = arith.divf %9, %10 : vector<16x1xf32>
    %12 = vector.broadcast %11 : vector<16x1xf32> to vector<16x128xf32>
    %13 = arith.subf %3, %12 : vector<16x128xf32>
    %14 = arith.mulf %13, %13 : vector<16x128xf32>
    %cst_9 = arith.constant dense<0.000000e+00> : vector<16xf32>
    %15 = vector.multi_reduction <add>, %14, %cst_9 [1] : vector<16x128xf32> to vector<16xf32>
    %16 = vector.shape_cast %15 : vector<16xf32> to vector<16x1xf32>
    %cst_10 = arith.constant 1.280000e+02 : f32
    %17 = vector.broadcast %cst_10 : f32 to vector<16x1xf32>
    %18 = arith.divf %16, %17 : vector<16x1xf32>
    %19 = vector.broadcast %11 : vector<16x1xf32> to vector<16x128xf32>
    %20 = arith.subf %3, %19 : vector<16x128xf32>
    %cst_11 = arith.constant 9.99999974E-6 : f32
    %21 = vector.broadcast %cst_11 : f32 to vector<16x1xf32>
    %22 = arith.addf %18, %21 : vector<16x1xf32>
    %23 = math.rsqrt %22 : vector<16x1xf32>
    %24 = vector.broadcast %23 : vector<16x1xf32> to vector<16x128xf32>
    %25 = arith.mulf %20, %24 : vector<16x128xf32>
    %26 = vector.broadcast %5 : vector<1x128xf32> to vector<16x128xf32>
    %27 = arith.mulf %25, %26 : vector<16x128xf32>
    %28 = vector.broadcast %7 : vector<1x128xf32> to vector<16x128xf32>
    %29 = arith.addf %27, %28 : vector<16x128xf32>
    %30 = arith.truncf %29 : vector<16x128xf32> to vector<16x128xbf16>
    %c0_12 = arith.constant 0 : index
    %c0_13 = arith.constant 0 : index
    %c0_14 = arith.constant 0 : index
    %31 = vector.load %arg5[%c0_12, %c0_13, %c0_14] : memref<1x128x384xbf16, #tpu.memory_space<vmem>>, vector<1x128x384xbf16>
    %32 = vector.shape_cast %31 : vector<1x128x384xbf16> to vector<128x384xbf16>
    %cst_15 = arith.constant dense<0.000000e+00> : vector<16x384xf32>
    %33 = tpu.matmul %30, %32, %cst_15 {dimension_numbers = #tpu.dot_dimension_numbers<[1], [0], [0], [1], [0, 0, 1, 1], [], []>} : vector<16x128xbf16>, vector<128x384xbf16>, vector<16x384xf32> -> vector<16x384xf32>
    %34 = vector.extract_strided_slice %33 {offsets = [0, 0], sizes = [16, 128], strides = [1, 1]} : vector<16x384xf32> to vector<16x128xf32>
    %35 = vector.shape_cast %34 : vector<16x128xf32> to vector<1x16x4x32xf32>
    %36 = tpu.transpose %35, [0, 2, 1, 3] : vector<1x16x4x32xf32> -> vector<1x4x16x32xf32>
    %37 = vector.shape_cast %36 : vector<1x4x16x32xf32> to vector<4x16x32xf32>
    %38 = arith.truncf %37 : vector<4x16x32xf32> to vector<4x16x32xbf16>
    %39 = vector.extract_strided_slice %33 {offsets = [0, 128], sizes = [16, 128], strides = [1, 1]} : vector<16x384xf32> to vector<16x128xf32>
    %40 = vector.shape_cast %39 : vector<16x128xf32> to vector<1x16x4x32xf32>
    %41 = tpu.transpose %40, [0, 2, 1, 3] : vector<1x16x4x32xf32> -> vector<1x4x16x32xf32>
    %42 = vector.shape_cast %41 : vector<1x4x16x32xf32> to vector<4x16x32xf32>
    %43 = arith.truncf %42 : vector<4x16x32xf32> to vector<4x16x32xbf16>
    %44 = vector.extract_strided_slice %33 {offsets = [0, 256], sizes = [16, 128], strides = [1, 1]} : vector<16x384xf32> to vector<16x128xf32>
    %45 = vector.shape_cast %44 : vector<16x128xf32> to vector<1x16x4x32xf32>
    %46 = tpu.transpose %45, [0, 2, 1, 3] : vector<1x16x4x32xf32> -> vector<1x4x16x32xf32>
    %47 = vector.shape_cast %46 : vector<1x4x16x32xf32> to vector<4x16x32xf32>
    %48 = arith.truncf %47 : vector<4x16x32xf32> to vector<4x16x32xbf16>
    "tpu.trace_start"() <{level = 10 : i32, message = "gnd,gmd->gnm"}> : () -> ()
    %cst_16 = arith.constant dense<0.000000e+00> : vector<4x16x16xf32>
    %49 = tpu.matmul %38, %43, %cst_16 {dimension_numbers = #tpu.dot_dimension_numbers<[2], [2], [1], [1], [0, 0, 0, 1, 1, 1], [0], [0]>} : vector<4x16x32xbf16>, vector<4x16x32xbf16>, vector<4x16x16xf32> -> vector<4x16x16xf32>
    "tpu.trace_stop"() : () -> ()
    %cst_17 = arith.constant dense<0xFF800000> : vector<4x16xf32>
    %50 = vector.multi_reduction <maximumf>, %49, %cst_17 [2] : vector<4x16x16xf32> to vector<4x16xf32>
    %51 = vector.shape_cast %50 : vector<4x16xf32> to vector<4x16x1xf32>
    %52 = vector.broadcast %51 : vector<4x16x1xf32> to vector<4x16x16xf32>
    %53 = arith.subf %49, %52 : vector<4x16x16xf32>
    %54 = math.exp %53 : vector<4x16x16xf32>
    %cst_18 = arith.constant dense<0.000000e+00> : vector<4x16xf32>
    %55 = vector.multi_reduction <add>, %54, %cst_18 [2] : vector<4x16x16xf32> to vector<4x16xf32>
    %56 = vector.shape_cast %55 : vector<4x16xf32> to vector<4x16x1xf32>
    %57 = tpu.reciprocal %56 {approx = true} : vector<4x16x1xf32> -> vector<4x16x1xf32>
    %58 = vector.broadcast %57 : vector<4x16x1xf32> to vector<4x16x16xf32>
    %59 = arith.mulf %54, %58 : vector<4x16x16xf32>
    %60 = arith.truncf %59 : vector<4x16x16xf32> to vector<4x16x16xbf16>
    "tpu.trace_start"() <{level = 10 : i32, message = "gnm,gmd->gnd"}> : () -> ()
    %cst_19 = arith.constant dense<0.000000e+00> : vector<4x16x32xf32>
    %61 = tpu.matmul %60, %48, %cst_19 {dimension_numbers = #tpu.dot_dimension_numbers<[2], [1], [1], [2], [0, 0, 0, 1, 1, 2], [0], [0]>} : vector<4x16x16xbf16>, vector<4x16x32xbf16>, vector<4x16x32xf32> -> vector<4x16x32xf32>
    "tpu.trace_stop"() : () -> ()
    %62 = vector.shape_cast %61 : vector<4x16x32xf32> to vector<1x4x16x32xf32>
    %63 = tpu.transpose %62, [0, 2, 1, 3] : vector<1x4x16x32xf32> -> vector<1x16x4x32xf32>
    %64 = vector.shape_cast %63 : vector<1x16x4x32xf32> to vector<16x128xf32>
    %65 = arith.truncf %64 : vector<16x128xf32> to vector<16x128xbf16>
    %c0_20 = arith.constant 0 : index
    %c0_21 = arith.constant 0 : index
    %c0_22 = arith.constant 0 : index
    %66 = vector.load %arg6[%c0_20, %c0_21, %c0_22] : memref<1x128x128xbf16, #tpu.memory_space<vmem>>, vector<1x128x128xbf16>
    %67 = vector.shape_cast %66 : vector<1x128x128xbf16> to vector<128x128xbf16>
    %cst_23 = arith.constant dense<0.000000e+00> : vector<16x128xf32>
    %68 = tpu.matmul %65, %67, %cst_23 {dimension_numbers = #tpu.dot_dimension_numbers<[1], [0], [0], [1], [0, 0, 1, 1], [], []>} : vector<16x128xbf16>, vector<128x128xbf16>, vector<16x128xf32> -> vector<16x128xf32>
    %c0_24 = arith.constant 0 : index
    %c0_25 = arith.constant 0 : index
    %c0_26 = arith.constant 0 : index
    %69 = vector.load %arg7[%c0_24, %c0_25, %c0_26] : memref<1x1x128xf32, #tpu.memory_space<vmem>>, vector<1x1x128xf32>
    %70 = vector.shape_cast %69 : vector<1x1x128xf32> to vector<1x128xf32>
    %71 = vector.broadcast %70 : vector<1x128xf32> to vector<16x128xf32>
    %72 = arith.addf %68, %71 : vector<16x128xf32>
    %73 = arith.addf %3, %72 : vector<16x128xf32>
    %c0_27 = arith.constant 0 : index
    %c0_28 = arith.constant 0 : index
    %c0_29 = arith.constant 0 : index
    %74 = vector.load %arg8[%c0_27, %c0_28, %c0_29] : memref<1x1x128xf32, #tpu.memory_space<vmem>>, vector<1x1x128xf32>
    %75 = vector.shape_cast %74 : vector<1x1x128xf32> to vector<1x128xf32>
    %c0_30 = arith.constant 0 : index
    %c0_31 = arith.constant 0 : index
    %c0_32 = arith.constant 0 : index
    %76 = vector.load %arg9[%c0_30, %c0_31, %c0_32] : memref<1x1x128xf32, #tpu.memory_space<vmem>>, vector<1x1x128xf32>
    %77 = vector.shape_cast %76 : vector<1x1x128xf32> to vector<1x128xf32>
    %cst_33 = arith.constant dense<0.000000e+00> : vector<16xf32>
    %78 = vector.multi_reduction <add>, %73, %cst_33 [1] : vector<16x128xf32> to vector<16xf32>
    %79 = vector.shape_cast %78 : vector<16xf32> to vector<16x1xf32>
    %cst_34 = arith.constant 1.280000e+02 : f32
    %80 = vector.broadcast %cst_34 : f32 to vector<16x1xf32>
    %81 = arith.divf %79, %80 : vector<16x1xf32>
    %82 = vector.broadcast %81 : vector<16x1xf32> to vector<16x128xf32>
    %83 = arith.subf %73, %82 : vector<16x128xf32>
    %84 = arith.mulf %83, %83 : vector<16x128xf32>
    %cst_35 = arith.constant dense<0.000000e+00> : vector<16xf32>
    %85 = vector.multi_reduction <add>, %84, %cst_35 [1] : vector<16x128xf32> to vector<16xf32>
    %86 = vector.shape_cast %85 : vector<16xf32> to vector<16x1xf32>
    %cst_36 = arith.constant 1.280000e+02 : f32
    %87 = vector.broadcast %cst_36 : f32 to vector<16x1xf32>
    %88 = arith.divf %86, %87 : vector<16x1xf32>
    %89 = vector.broadcast %81 : vector<16x1xf32> to vector<16x128xf32>
    %90 = arith.subf %73, %89 : vector<16x128xf32>
    %cst_37 = arith.constant 9.99999974E-6 : f32
    %91 = vector.broadcast %cst_37 : f32 to vector<16x1xf32>
    %92 = arith.addf %88, %91 : vector<16x1xf32>
    %93 = math.rsqrt %92 : vector<16x1xf32>
    %94 = vector.broadcast %93 : vector<16x1xf32> to vector<16x128xf32>
    %95 = arith.mulf %90, %94 : vector<16x128xf32>
    %96 = vector.broadcast %75 : vector<1x128xf32> to vector<16x128xf32>
    %97 = arith.mulf %95, %96 : vector<16x128xf32>
    %98 = vector.broadcast %77 : vector<1x128xf32> to vector<16x128xf32>
    %99 = arith.addf %97, %98 : vector<16x128xf32>
    %100 = arith.truncf %99 : vector<16x128xf32> to vector<16x128xbf16>
    %c0_38 = arith.constant 0 : index
    %c0_39 = arith.constant 0 : index
    %c0_40 = arith.constant 0 : index
    %101 = vector.load %arg10[%c0_38, %c0_39, %c0_40] : memref<1x128x256xbf16, #tpu.memory_space<vmem>>, vector<1x128x256xbf16>
    %102 = vector.shape_cast %101 : vector<1x128x256xbf16> to vector<128x256xbf16>
    %cst_41 = arith.constant dense<0.000000e+00> : vector<16x256xf32>
    %103 = tpu.matmul %100, %102, %cst_41 {dimension_numbers = #tpu.dot_dimension_numbers<[1], [0], [0], [1], [0, 0, 1, 1], [], []>} : vector<16x128xbf16>, vector<128x256xbf16>, vector<16x256xf32> -> vector<16x256xf32>
    %c0_42 = arith.constant 0 : index
    %c0_43 = arith.constant 0 : index
    %c0_44 = arith.constant 0 : index
    %104 = vector.load %arg11[%c0_42, %c0_43, %c0_44] : memref<1x1x256xf32, #tpu.memory_space<vmem>>, vector<1x1x256xf32>
    %105 = vector.shape_cast %104 : vector<1x1x256xf32> to vector<1x256xf32>
    %106 = vector.broadcast %105 : vector<1x256xf32> to vector<16x256xf32>
    %107 = arith.addf %103, %106 : vector<16x256xf32>
    %cst_45 = arith.constant 5.000000e-01 : f32
    %108 = vector.broadcast %cst_45 : f32 to vector<16x256xf32>
    %109 = arith.mulf %108, %107 : vector<16x256xf32>
    %cst_46 = arith.constant 0.707106769 : f32
    %110 = vector.broadcast %cst_46 : f32 to vector<16x256xf32>
    %111 = arith.mulf %107, %110 : vector<16x256xf32>
    %112 = math.erf %111 : vector<16x256xf32>
    %cst_47 = arith.constant 1.000000e+00 : f32
    %113 = vector.broadcast %cst_47 : f32 to vector<16x256xf32>
    %114 = arith.addf %113, %112 : vector<16x256xf32>
    %115 = arith.mulf %109, %114 : vector<16x256xf32>
    %116 = arith.truncf %115 : vector<16x256xf32> to vector<16x256xbf16>
    %c0_48 = arith.constant 0 : index
    %c0_49 = arith.constant 0 : index
    %c0_50 = arith.constant 0 : index
    %117 = vector.load %arg12[%c0_48, %c0_49, %c0_50] : memref<1x256x128xbf16, #tpu.memory_space<vmem>>, vector<1x256x128xbf16>
    %118 = vector.shape_cast %117 : vector<1x256x128xbf16> to vector<256x128xbf16>
    %cst_51 = arith.constant dense<0.000000e+00> : vector<16x128xf32>
    %119 = tpu.matmul %116, %118, %cst_51 {dimension_numbers = #tpu.dot_dimension_numbers<[1], [0], [0], [1], [0, 0, 1, 1], [], []>} : vector<16x256xbf16>, vector<256x128xbf16>, vector<16x128xf32> -> vector<16x128xf32>
    %c0_52 = arith.constant 0 : index
    %c0_53 = arith.constant 0 : index
    %c0_54 = arith.constant 0 : index
    %120 = vector.load %arg13[%c0_52, %c0_53, %c0_54] : memref<1x1x128xf32, #tpu.memory_space<vmem>>, vector<1x1x128xf32>
    %121 = vector.shape_cast %120 : vector<1x1x128xf32> to vector<1x128xf32>
    %122 = vector.broadcast %121 : vector<1x128xf32> to vector<16x128xf32>
    %123 = arith.addf %119, %122 : vector<16x128xf32>
    %124 = arith.addf %73, %123 : vector<16x128xf32>
    %c0_55 = arith.constant 0 : index
    %c0_56 = arith.constant 0 : index
    %125 = vector.load %arg14[%c0_55, %c0_56] : memref<16x128xf32, #tpu.memory_space<vmem>>, vector<16x128xf32>
    tpu.vector_store %arg14[%c0_55, %c0_56], %124 {strides = array<i32>} : memref<16x128xf32, #tpu.memory_space<vmem>>, vector<16x128xf32>,
    return
  }
  func.func @transform_1(%arg0: i32, %arg1: i32) -> (i32, i32, i32) {
    %c0_i32 = arith.constant 0 : i32
    %c0_i32_0 = arith.constant 0 : i32
    %c0_i32_1 = arith.constant 0 : i32
    return %arg1, %c0_i32, %c0_i32_0 : i32, i32, i32
  }
  func.func @transform_2(%arg0: i32, %arg1: i32) -> (i32, i32, i32) {
    %c0_i32 = arith.constant 0 : i32
    %c0_i32_0 = arith.constant 0 : i32
    %c0_i32_1 = arith.constant 0 : i32
    return %arg1, %c0_i32, %c0_i32_0 : i32, i32, i32
  }
  func.func @transform_3(%arg0: i32, %arg1: i32) -> (i32, i32, i32) {
    %c0_i32 = arith.constant 0 : i32
    %c0_i32_0 = arith.constant 0 : i32
    %c0_i32_1 = arith.constant 0 : i32
    return %arg1, %c0_i32, %c0_i32_0 : i32, i32, i32
  }
  func.func @transform_4(%arg0: i32, %arg1: i32) -> (i32, i32, i32) {
    %c0_i32 = arith.constant 0 : i32
    %c0_i32_0 = arith.constant 0 : i32
    %c0_i32_1 = arith.constant 0 : i32
    return %arg1, %c0_i32, %c0_i32_0 : i32, i32, i32
  }
  func.func @transform_5(%arg0: i32, %arg1: i32) -> (i32, i32, i32) {
    %c0_i32 = arith.constant 0 : i32
    %c0_i32_0 = arith.constant 0 : i32
    %c0_i32_1 = arith.constant 0 : i32
    return %arg1, %c0_i32, %c0_i32_0 : i32, i32, i32
  }
  func.func @transform_6(%arg0: i32, %arg1: i32) -> (i32, i32, i32) {
    %c0_i32 = arith.constant 0 : i32
    %c0_i32_0 = arith.constant 0 : i32
    %c0_i32_1 = arith.constant 0 : i32
    return %arg1, %c0_i32, %c0_i32_0 : i32, i32, i32
  }
  func.func @transform_7(%arg0: i32, %arg1: i32) -> (i32, i32, i32) {
    %c0_i32 = arith.constant 0 : i32
    %c0_i32_0 = arith.constant 0 : i32
    %c0_i32_1 = arith.constant 0 : i32
    return %arg1, %c0_i32, %c0_i32_0 : i32, i32, i32
  }
  func.func @transform_8(%arg0: i32, %arg1: i32) -> (i32, i32, i32) {
    %c0_i32 = arith.constant 0 : i32
    %c0_i32_0 = arith.constant 0 : i32
    %c0_i32_1 = arith.constant 0 : i32
    return %arg1, %c0_i32, %c0_i32_0 : i32, i32, i32
  }
  func.func @transform_9(%arg0: i32, %arg1: i32) -> (i32, i32, i32) {
    %c0_i32 = arith.constant 0 : i32
    %c0_i32_0 = arith.constant 0 : i32
    %c0_i32_1 = arith.constant 0 : i32
    return %arg1, %c0_i32, %c0_i32_0 : i32, i32, i32
  }
  func.func @transform_10(%arg0: i32, %arg1: i32) -> (i32, i32, i32) {
    %c0_i32 = arith.constant 0 : i32
    %c0_i32_0 = arith.constant 0 : i32
    %c0_i32_1 = arith.constant 0 : i32
    return %arg1, %c0_i32, %c0_i32_0 : i32, i32, i32
  }
  func.func @transform_11(%arg0: i32, %arg1: i32) -> (i32, i32, i32) {
    %c0_i32 = arith.constant 0 : i32
    %c0_i32_0 = arith.constant 0 : i32
    %c0_i32_1 = arith.constant 0 : i32
    return %arg1, %c0_i32, %c0_i32_0 : i32, i32, i32
  }
  func.func @transform_12(%arg0: i32, %arg1: i32) -> (i32, i32) {
    %c0_i32 = arith.constant 0 : i32
    %c0_i32_0 = arith.constant 0 : i32
    return %arg0, %c0_i32 : i32, i32
  }
}

</mosaic_0001>

<bundles_post_ra>
// kernel: transformer_forward.1
= control target key start
LH: loop header
LB: loop body
LE: loop exit
PB: predicated region body
PF: predicated region fallthrough
CT: control target
= control target key end

     0   :  { %s5513_s0 = inlined_call_operand.hbm [shape: f32[32,128], index: 0, kind: input, shape index: {}]   ;;  %s5514_s1 = inlined_call_operand.vmem [shape: f32[2,1,128], index: 1, kind: input, shape index: {}]   ;;  %s5515_s2 = inlined_call_operand.hbm [shape: f32[2,1,128], index: 2, kind: input, shape index: {}]   ;;  %s5516_s3 = inlined_call_operand.hbm [shape: bf16[2,128,384], index: 3, kind: input, shape index: {}]   ;;  %s5517_s4 = inlined_call_operand.hbm [shape: bf16[2,128,128], index: 4, kind: input, shape index: {}]   ;;  %s5518_s5 = inlined_call_operand.vmem [shape: f32[2,1,128], index: 5, kind: input, shape index: {}]   ;;  %s5519_s6 = inlined_call_operand.vmem [shape: f32[2,1,128], index: 6, kind: input, shape index: {}]   ;;  %s5520_s7 = inlined_call_operand.hbm [shape: f32[2,1,128], index: 7, kind: input, shape index: {}]   ;;  %s5521_s8 = inlined_call_operand.hbm [shape: bf16[2,128,256], index: 8, kind: input, shape index: {}]   ;;  %s5522_s9 = inlined_call_operand.hbm [shape: f32[2,1,256], index: 9, kind: input, shape index: {}]   ;;  %s5523_s10 = inlined_call_operand.hbm [shape: bf16[2,256,128], index: 10, kind: input, shape index: {}]   ;;  %s5524_s11 = inlined_call_operand.hbm [shape: f32[2,1,128], index: 11, kind: input, shape index: {}]   ;;  %s5525_s12 = inlined_call_operand.hbm [shape: f32[32,128], index: 12, kind: output, shape index: {}]  }
   0x1   :  { %5547 = sst [smem:[#allocation44_spill]] %s5513_s0 }
   0x2   :  { %5548 = sst [smem:[#allocation45_spill]] %s5514_s1 }
   0x3   :  { %5549 = sst [smem:[#allocation46_spill]] %s5515_s2 }
   0x4   :  { %5550 = sst [smem:[#allocation47_spill]] %s5516_s3 }
   0x5   :  { %5551 = sst [smem:[#allocation48_spill]] %s5517_s4 }
   0x6   :  { %5552 = sst [smem:[#allocation49_spill]] %s5518_s5 }
   0x7   :  { %5553 = sst [smem:[#allocation50_spill]] %s5519_s6 }
   0x8   :  { %5554 = sst [smem:[#allocation51_spill]] %s5520_s7 }
   0x9   :  { %5555 = sst [smem:[#allocation52_spill]] %s5521_s8 }
   0xa   :  { %5556 = sst [smem:[#allocation53_spill]] %s5522_s9 }
   0xb   :  { %5557 = sst [smem:[#allocation54_spill]] %s5525_s12 }
   0xc   :  { %17 = vsyncpa [#allocation3], 0 }
   0xd   :  { %19 = vsyncpa [#allocation3 + $0x1], 0 }
   0xe   :  { %20 = vsyncpa [#allocation6], 0 }
   0xf   :  { %22 = vsyncpa [#allocation6 + $0x1], 0 }
  0x10   :  { %23 = vsyncpa [#allocation9], 0 }
  0x11   :  { %25 = vsyncpa [#allocation9 + $0x1], 0 }
  0x12   :  { %26 = vsyncpa [#allocation12], 0 }
  0x13   :  { %28 = vsyncpa [#allocation12 + $0x1], 0 }
  0x14   :  { %29 = vsyncpa [#allocation15], 0 }
  0x15   :  { %31 = vsyncpa [#allocation15 + $0x1], 0 }
  0x16   :  { %32 = vsyncpa [#allocation4], 0 }
  0x17   :  { %34 = vsyncpa [#allocation4 + $0x1], 0  ;;  %s4339_s21 = smov 0   ;;  %s4341_s22 = smov 0  }
  0x18   :  { %s4343_s23 = smov 0   ;;  %s4345_s24 = smov 0  }
  0x19   :  { %s4347_s25 = smov 0   ;;  %s4349_s26 = smov 0  }
  0x1a   :  { %s4351_s27 = smov 0   ;;  %s4353_s28 = smov 0  }
  0x1b   :  { %s4355_s29 = smov 0   ;;  %s4357_s30 = smov 0  }
  0x1c   :  { %s4359_s13 = smov 0  }
  0x1d LB: > { %5558 = sst [smem:[#allocation29_spill]] %s4218_s21  ;;  %s4393_s14 = sadd.s32 4294967295, %s4258_s13   ;;  %s4258_s13 = sphi %s4359_s13, %s40_s13   ;;  %s4254_s30 = sphi %s4357_s30, %s5620_s30   ;;  %s4250_s29 = sphi %s4355_s29, %s5624_s29   ;;  %s4246_s28 = sphi %s4353_s28, %s5618_s28   ;;  %s4242_s27 = sphi %s4351_s27, %s5623_s27   ;;  %s4238_s26 = sphi %s4349_s26, %s5617_s26   ;;  %s4234_s25 = sphi %s4347_s25, %s5622_s25   ;;  %s4230_s24 = sphi %s4345_s24, %s5621_s24   ;;  %s4226_s23 = sphi %s4343_s23, %s5615_s23   ;;  %s4222_s22 = sphi %s4341_s22, %s5614_s22   ;;  %s4218_s21 = sphi %s4339_s21, %s5613_s21  }
  0x1e   : > { %5559 = sst [smem:[#allocation30_spill]] %s4222_s22  ;;  %s3218_s15 = sadd.s32 4294967294, %s4258_s13  }
  0x1f   : > { %5560 = sst [smem:[#allocation31_spill]] %s4226_s23  ;;  %s49_s16 = sadd.s32 1, %s4250_s29 }
  0x20   : > { %5561 = sst [smem:[#allocation32_spill]] %s4238_s26  ;;  %s52_s17 = sadd.s32 1, %s4254_s30 }
  0x21   : > { %5562 = sst [smem:[#allocation33_spill]] %s4242_s27  ;;  %p50_p0 = scmp.ge.s32.totalorder %s49_s16, 2 }
  0x22   : > { %5563 = sst [smem:[#allocation34_spill]] %s4246_s28  ;;  %s85_s18 = sadd.s32 1, %s4238_s26 }
  0x23   : > { %5564 = sst [smem:[#allocation35_spill]] %s4254_s30  ;;  %p92_p1 = scmp.ne.s32.totalorder %s4238_s26, %s4234_s25 }
  0x24   : > { %5565 = sst [smem:[#allocation36_spill]] %s4258_s13  ;;  %p93_p2 = scmp.eq.s32.totalorder %s4258_s13, 0 }
  0x25   : > { %5566 = sst [smem:[#allocation37_spill]] %s4393_s14  ;;  %s5626_s16 = smov (%p50_p0, %s49_s16), 0 }
  0x26   : > { %5567 = sst [smem:[#allocation38_spill]] %s5626_s16  ;;  %s5628_s17 = smov (!%p50_p0, %s52_s17), %s4254_s30 }
  0x27   : > { %s82_s19 = ssub.s32 %s4250_s29, %s5626_s16  ;;  %p4407_p3 = por %p93_p2, %p92_p1 }
  0x28   : > { %p54_p4 = scmp.ge.s32.totalorder %s5628_s17, 2  ;;  %p83_p5 = scmp.eq.s32.totalorder %s82_s19, 0 }
  0x29   : > { %p98_p6 = scmp.ne.s32.totalorder %s4234_s25, %s4230_s24  ;;  %p99_p7 = scmp.eq.s32.totalorder %s4393_s14, 0 }
  0x2a   : > { %s5630_s17 = smov (%p54_p4, %s5628_s17), 0  ;;  %s345_s28 = sadd.s32 1, %s4226_s23 }
  0x2b   : > { %5569 = sst [smem:[#allocation39_spill]] %s5630_s17  ;;  %p4418_p8 = por %p99_p7, %p98_p6 }
  0x2c   : > { %s4416_s12 = scalar_select %p83_p5, %s4238_s26, %s85_s18  }
  0x2d   : > { %s342_s0 = ssub.s32 %s4254_s30, %s5630_s17  ;;  %p355_p10 = scmp.ne.s32.totalorder %s4226_s23, %s4222_s22 }
  0x2e   : > { %5570 = sst [smem:[#allocation40_spill]] %s4416_s12  ;;  %p343_p9 = scmp.eq.s32.totalorder %s342_s0, 0 }
  0x2f   : > { %p356_p11 = scmp.eq.s32.totalorder %s4393_s14, 3  ;;  %p361_p13 = scmp.ne.s32.totalorder %s4222_s22, %s4218_s21 }
  0x30   : > { %s4429_s19 = scalar_select %p343_p9, %s4226_s23, %s345_s28  }
  0x31   : > { %p4431_p12 = por %p356_p11, %p355_p10  ;;  %p362_p0 = scmp.eq.s32.totalorder %s3218_s15, 3 }
  0x32   : > { %5572 = sst [smem:[#allocation41_spill]] %s4429_s19  ;;  %p3632_p1 = scmp.lt.s32.totalorder %s4258_s13, 4 }
  0x33   : > { %s5573_s24 = scalar_select %p4431_p12, 1, 0 }
  0x34   : > { %s4439_s18 = sand.u32 1, %s4238_s26   ;;  %p4441_p2 = por %p362_p0, %p361_p13 }
  0x35   : > { %5574 = sst [smem:[#allocation42_spill]] %s5573_s24  ;;  %s4446_s0 = sand.u32 1, %s4258_s13  }
  0x36   : > { %s5575_s12 = scalar_select %p4441_p2, 1, 0 }
  0x37   : > { %p4450_p4 = pnand %p3632_p1, %p4407_p3  ;;  %s3582_s15 = smul.u32 192, %s4439_s18 }
  0x38   : > { %5576 = sst [smem:[#allocation43_spill]] %s5575_s12  ;;  %s3583_s17 = smul.u32 192, %s4250_s29 }
  0x39   : > { %s5578_s3 = sld [smem:[#allocation47_spill]]  ;;  %s409_s23 = scalar_lea.vmem [#allocation5], %s3582_s15 }
  0x3a   : > { %s417_s12 = sshll.u32 %s409_s23, 4  ;;  %p3233_p3 = scmp.ge.s32.totalorder %s4258_s13, 1  ;;  %s418_s12 = int_to_ptr.vmem [resolvable:$true] %s417_s12 }
  0x3b   : > { %s5537_s20 = scalar_lea.sflag [#allocation6], %s4446_s0  ;;  %s4260_s24 = smov 192  }
  0x3c   : > { %s4261_s6 = smov 12   ;;  %p556_p5 = scmp.lt.s32.totalorder %s4258_s13, 5 }
  0x3d   : > { %s5579_s7 = sld [smem:[#allocation51_spill]]  ;;  %s464_s15 = scalar_lea.vmem [#allocation8], %s4439_s18 }
  0x3e   : > { %p4470_p6 = pnand %p3233_p3, %p556_p5  ;;  %s5581_s9 = sld [smem:[#allocation53_spill]] }
  0x3f   : > { %s414_s19 = scalar_lea.hbm %s5578_s3, %s3583_s17  ;;  %s471_s3 = sshll.u32 %s464_s15, 4  ;;  %s472_s3 = int_to_ptr.vmem [resolvable:$true] %s471_s3 }
  0x40   : > { %s415_s21 = sshll.u32 %s414_s19, 4  ;;  %s5541_s15 = scalar_lea.sflag [#allocation12], %s4446_s0  ;;  %s416_s21 = int_to_ptr.hbm [resolvable:$true] %s415_s21 }
  0x41   : > { %3609 = dma.hbm_to_vmem [thread:$0]  (!%p4450_p4), %s416_s21, 3072, %s418_s12, %s5537_s20, %s4260_s24, %s4260_s24, %s4261_s6  }
  0x42   : > { %s5538_s6 = scalar_lea.sflag [#allocation9], %s4446_s0  ;;  %s3228_s12 = sshll.u32 %s4439_s18, 1 }
  0x43   : > { %s467_s23 = scalar_lea.hbm %s5579_s7, %s4250_s29  ;;  %s3229_s21 = sshll.u32 %s4250_s29, 1 }
  0x44   : > { %s469_s19 = sshll.u32 %s467_s23, 4  ;;  %s508_s30 = scalar_lea.hbm %s5581_s9, %s3229_s21  ;;  %s470_s19 = int_to_ptr.hbm [resolvable:$true] %s469_s19 }
  0x45   : > { %3615 = dma.hbm_to_vmem [thread:$0]  (!%p4450_p4), %s470_s19, 16, %s472_s3, %s5538_s6  }
  0x46   : > { %s510_s23 = sshll.u32 %s508_s30, 4  ;;  %s504_s20 = scalar_lea.vmem [#allocation11], %s3228_s12  ;;  %s511_s23 = int_to_ptr.hbm [resolvable:$true] %s510_s23 }
  0x47   : > { %s512_s7 = sshll.u32 %s504_s20, 4  ;;  %s5582_s2 = sld [smem:[#allocation46_spill]]  ;;  %s513_s7 = int_to_ptr.vmem [resolvable:$true] %s512_s7 }
  0x48   : > { %3621 = dma.hbm_to_vmem [thread:$0]  (!%p4450_p4), %s511_s23, 32, %s513_s7, %s5541_s15  }
  0x49   : > { %s391_s13 = scalar_lea.vmem [#allocation2], %s4439_s18  ;;  %s3222_s20 = sshll.u32 %s4439_s18, 6 }
  0x4a   : > { %s398_s24 = sshll.u32 %s391_s13, 4  ;;  %s389_s12 = scalar_lea.sflag [#allocation3], %s4439_s18  ;;  %s399_s24 = int_to_ptr.vmem [resolvable:$true] %s398_s24 }
  0x4b   : > { %s3514_s21 = sshll.u32 %s4250_s29, 6  ;;  %s5583_s4 = sld [smem:[#allocation48_spill]] }
  0x4c   : > { %s431_s3 = scalar_lea.vmem [#allocation7], %s3222_s20  ;;  %s3225_s13 = sshll.u32 %s4439_s18, 7 }
  0x4d   : > { %s394_s6 = scalar_lea.hbm %s5582_s2, %s4250_s29  ;;  %s439_s19 = sshll.u32 %s431_s3, 4  ;;  %s440_s19 = int_to_ptr.vmem [resolvable:$true] %s439_s19 }
  0x4e   : > { %s396_s26 = sshll.u32 %s394_s6, 4  ;;  %s4262_s6 = smov 64   ;;  %s397_s26 = int_to_ptr.hbm [resolvable:$true] %s396_s26 }
  0x4f   : > { %3606 = dma.hbm_to_vmem [thread:$0]  (!%p4450_p4), %s397_s26, 16, %s399_s24, %s389_s12  }
  0x50   : > { %s4263_s2 = smov 4   ;;  %s5584_s9 = scalar_lea.sflag [#allocation6], %s4446_s0 }
  0x51   : > { %s436_s23 = scalar_lea.hbm %s5583_s4, %s3514_s21  ;;  %s3515_s5 = sshll.u32 %s4250_s29, 7 }
  0x52   : > { %s437_s15 = sshll.u32 %s436_s23, 4  ;;  %s5585_s8 = sld [smem:[#allocation52_spill]]  ;;  %s438_s15 = int_to_ptr.hbm [resolvable:$true] %s437_s15 }
  0x53   : > { %3612 = dma.hbm_to_vmem [thread:$0]  (!%p4450_p4), %s438_s15, 1024, %s440_s19, %s5584_s9, %s4262_s6, %s4262_s6, %s4263_s2  }
  0x54   : > { %s482_s20 = scalar_lea.vmem [#allocation10], %s3225_s13  ;;  %s4264_s7 = smov 128  }
  0x55   : > { %s490_s21 = sshll.u32 %s482_s20, 4  ;;  %s4265_s23 = smov 8   ;;  %s491_s21 = int_to_ptr.vmem [resolvable:$true] %s490_s21 }
  0x56   : > { %s5586_s3 = scalar_lea.sflag [#allocation9], %s4446_s0  ;;  %s528_s19 = scalar_lea.hbm %s5523_s10, %s3515_s5 }
  0x57   : > { %s523_s24 = scalar_lea.vmem [#allocation13], %s3225_s13  ;;  %s529_s4 = sshll.u32 %s528_s19, 4  ;;  %s530_s4 = int_to_ptr.hbm [resolvable:$true] %s529_s4 }
  0x58   : > { %s487_s12 = scalar_lea.hbm %s5585_s8, %s3515_s5  ;;  %s531_s26 = sshll.u32 %s523_s24, 4  ;;  %s532_s26 = int_to_ptr.vmem [resolvable:$true] %s531_s26 }
  0x59   : > { %s488_s30 = sshll.u32 %s487_s12, 4  ;;  %s5587_s12 = scalar_lea.sflag [#allocation12], %s4446_s0  ;;  %s489_s30 = int_to_ptr.hbm [resolvable:$true] %s488_s30 }
  0x5a   : > { %3618 = dma.hbm_to_vmem [thread:$0]  (!%p4450_p4), %s489_s30, 2048, %s491_s21, %s5586_s3, %s4264_s7, %s4264_s7, %s4265_s23  }
  0x5b   : > { %3624 = dma.hbm_to_vmem [thread:$0]  (!%p4450_p4), %s530_s4, 2048, %s532_s26, %s5587_s12, %s4262_s6, %s4262_s6, %s4263_s2  }
  0x5c   : > { %s547_s1 = scalar_lea.hbm %s5524_s11, %s4250_s29  ;;  %s544_s22 = scalar_lea.vmem [#allocation14], %s4439_s18 }
  0x5d   : > { %s549_s27 = sshll.u32 %s547_s1, 4  ;;  %s551_s14 = sshll.u32 %s544_s22, 4  ;;  %s550_s27 = int_to_ptr.hbm [resolvable:$true] %s549_s27  ;;  %s552_s14 = int_to_ptr.vmem [resolvable:$true] %s551_s14 }
  0x5e   : > { %s542_s21 = scalar_lea.sflag [#allocation15], %s4439_s18  ;;  %560 = sbr.rel (%p4470_p6) target bundleno = 2221 (0x8ad), region = 64 }
  0x5f   : > { %3627 = dma.hbm_to_vmem [thread:$0]  (!%p4450_p4), %s550_s27, 16, %s552_s14, %s542_s21  }
  0x60   : > { %s4534_s5 = sand.u32 (!%p4470_p6), 1, %s4234_s25  }
  0x61   : > { %s563_s2 = scalar_lea.sflag (!%p4470_p6), [#allocation3], %s4534_s5 }
  0x63   : > { %4191 = dma.done.wait (%p4418_p8), %s563_s2, 16  }
  0x64   : > { %4193 = vsyncadd (%p4418_p8), %s563_s2, 4294967280  ;;  %s5588_s1 = sld [smem:[#allocation37_spill]]  ;;  %s3584_s22 = smul.u32 192, %s4534_s5 }
  0x66   : > { %s4544_s14 = scalar_lea.vmem [#allocation5], %s3584_s22 }
  0x6a   : > { %s571_s8 = sand.u32 1, %s5588_s1  }
  0x6b   : > { %s572_s27 = scalar_lea.sflag [#allocation6], %s571_s8 }
  0x6c   : > { %4195 = dma.done.wait (%p4418_p8), %s572_s27, 4096  }
  0x6d   : > { %4197 = vsyncadd (%p4418_p8), %s572_s27, 4294963200  ;;  %s3234_s18 = sshll.u32 %s4534_s5, 6  ;;  %s592_s28 = scalar_lea.sflag [#allocation9], %s571_s8 }
  0x6e   : > { %s4551_s0 = scalar_lea.vmem [#allocation7], %s3234_s18 }
  0x6f   : > { %4199 = dma.done.wait (%p4418_p8), %s592_s28, 2064  }
  0x70   : > { %4201 = vsyncadd (%p4418_p8), %s592_s28, 4294965232  ;;  %s3235_s13 = sshll.u32 %s4534_s5, 7  ;;  %s3236_s6 = sshll.u32 %s4534_s5, 1 }
  0x71   : > { %s4560_s30 = scalar_lea.vmem [#allocation10], %s3235_s13  ;;  %s611_s7 = scalar_lea.sflag [#allocation12], %s571_s8 }
  0x72   : > { %s4562_s23 = scalar_lea.vmem [#allocation11], %s3236_s6 }
  0x73   : > { %4203 = dma.done.wait (%p4418_p8), %s611_s7, 2080  }
  0x74   : > { %4205 = vsyncadd (%p4418_p8), %s611_s7, 4294965216  ;;  %s4568_s3 = scalar_lea.vmem [#allocation13], %s3235_s13  ;;  %s631_s9 = scalar_lea.sflag [#allocation15], %s4534_s5 }
  0x75   : > { %4207 = dma.done.wait (%p4418_p8), %s631_s9, 16  }
  0x76   : > { %4209 = vsyncadd (%p4418_p8), %s631_s9, 4294967280  ;;  %s5589_s19 = sld [smem:[#allocation30_spill]] }
  0x77   : > { %s5590_s24 = sld [smem:[#allocation33_spill]] }
  0x78   : > { %s5591_s1 = sld [smem:[#allocation45_spill]] }
  0x79   : > { %s5592_s27 = sld [smem:[#allocation49_spill]] }
  0x7a   : > { %s5593_s6 = sld [smem:[#allocation50_spill]] }
  0x7c   : > { %s5546_s26 = sand.u32 1, %s5589_s19  }
  0x7d   : > { %p714_p7 = scmp.lt.s32.totalorder %s5590_s24, 1  ;;  %s3238_s12 = sshll.u32 %s5546_s26, 4 }
  0x7e   : > { %s4595_s9 = scalar_lea.vmem [#allocation16], %s3238_s12  ;;  %p3239_p8 = scmp.ne.s32.totalorder %s5590_s24, 0 }
  0x7f   : > { %s4581_s20 = scalar_select %p714_p7, %s5590_s24, 1 }
  0x80   : > { %728 = sbr.rel (%p3239_p8) target bundleno = 155 (0x9b), region = 100  ;;  %s5594_s19 = sld [smem:[#allocation34_spill]] (!%p3239_p8) }
  0x81   : > { %s716_s8 = scalar_lea.vmem %s5591_s1, %s4581_s20  ;;  %s719_s18 = scalar_lea.vmem %s5592_s27, %s4581_s20 }
  0x82   : > { %s722_s7 = scalar_lea.vmem %s5593_s6, %s4581_s20 }
  0x86   : > { %s3240_s26 = sshll.u32 %s5594_s19, 4 }
  0x87   : > { %s5595_s2 = sld [smem:[#allocation44_spill]]  ;;  %s740_s17 = sshll.u32 %s4595_s9, 4  ;;  %s741_s17 = int_to_ptr.vmem [resolvable:$true] %s740_s17 }
  0x8d   : > { %s730_s1 = scalar_lea.hbm %s5595_s2, %s3240_s26  ;;  %s4098_s24 = scalar_lea.hbm %s5595_s2, 32 }
  0x8e   : > { %s738_s4 = sshll.u32 %s730_s1, 4  ;;  %s739_s4 = int_to_ptr.hbm [resolvable:$true] %s738_s4 }
  0x8f   : > { %s4094_s22 = sshra.s32 %s739_s4, 4  ;;  %s4095_s22 = int_to_ptr.hbm [resolvable:$true] %s4094_s22 }
  0x90   : > { %s4096_s16 = scalar_lea.hbm %s4095_s22, 16  ;;  %p4099_p10 = scmp.lt.s32.totalorder %s4095_s22, %s5595_s2 }
  0x91   : > { %p4097_p9 = scmp.ne.s32.totalorder %s4095_s22, %s4096_s16  ;;  %p4100_p11 = scmp.lt.s32.totalorder %s4098_s24, %s4096_s16 }
  0x93   : > { %p4101_p13 = por %p4100_p11, %p4099_p10 }
  0x95   : > { %p4102_p0 = pnand %p4101_p13, %p4097_p9 }
  0x97   : > { %4105 = shalt.err (!%p4102_p0)  }
  0x98   : > { %743 = dma.hbm_to_vmem [thread:$0]  %s739_s4, 256, %s741_s17, [#allocation17] }
  0x99   : > { %4210 = dma.done.wait [#allocation17], 256 }
  0x9a   : > { %4211 = vsyncadd [#allocation17], 4294967040 }
  0x9b PF: > { %v747_v0 = vld [vmem:[%s4595_s9] sm:$0xff]  ;;  %v748_v1 = vld [vmem:[%s4595_s9 + $0x8] sm:$0xff]  ;;  %v4266_v2 = vmov 128.0   ;;  %s5597_s15 = scalar_lea.vmem [#allocation2], %s4534_s5  ;;  %s4267_s26 = smov 32   ;;  %vm1032_vm7 = vcmask 1047556  }
  0x9c   : > { %751 = vadd.xlane.f32.xlu0 %v747_v0  ;;  %3802 = vrcp.f32 %v4266_v2  ;;  %v3327_v17 = vld [vmem:[%s4544_s14 + $0xa8] sm:$0xf]  ;;  %v3539_v18 = vld [vmem:[%s4544_s14 + $0xb0] sm:$0xf0]  ;;  %v3538_v19 = vld [vmem:[%s4544_s14 + $0xac] sm:$0xf] }
  0x9d   : > { %v3328_v20 = vor.u32 %v3539_v18, %v3327_v17  ;;  %v3329_v21 = vld [vmem:[%s4544_s14 + $0xb4] sm:$0xf0]  ;;  %v3335_v22 = vld [vmem:[%s4544_s14 + $0xb0] sm:$0xf]  ;;  %v3540_v23 = vld [vmem:[%s4544_s14 + $0xb8] sm:$0xf0] }
  0x9e   : > { %v3332_v24 = vor.u32 %v3538_v19, %v3329_v21  ;;  %v3336_v25 = vor.u32 %v3540_v23, %v3335_v22  ;;  %v3315_v26 = vld [vmem:[%s4544_s14 + $0x90] sm:$0xf]  ;;  %v3536_v27 = vld [vmem:[%s4544_s14 + $0x98] sm:$0xf0]  ;;  %v3535_v28 = vld [vmem:[%s4544_s14 + $0x94] sm:$0xf] }
  0x9f   : > { %969 = vmatpush.bf16.msra.mxu0 %v3328_v20  ;;  %v3316_v29 = vor.u32 %v3536_v27, %v3315_v26  ;;  %v3317_v30 = vld [vmem:[%s4544_s14 + $0x9c] sm:$0xf0]  ;;  %v3323_v31 = vld [vmem:[%s4544_s14 + $0x98] sm:$0xf]  ;;  %v3537_v32 = vld [vmem:[%s4544_s14 + $0xa0] sm:$0xf0] }
  0xa0   : > { %983 = vmatpush.bf16.msra.mxu1 %v3332_v24  ;;  %997 = vmatpush.bf16.msra.mxu2 %v3336_v25  ;;  %v3320_v33 = vor.u32 %v3535_v28, %v3317_v30  ;;  %v3324_v34 = vor.u32 %v3537_v32, %v3323_v31  ;;  %v3303_v35 = vld [vmem:[%s4544_s14 + $0x78] sm:$0xf]  ;;  %v3533_v36 = vld [vmem:[%s4544_s14 + $0x80] sm:$0xf0]  ;;  %v3532_v37 = vld [vmem:[%s4544_s14 + $0x7c] sm:$0xf] }
  0xa1   : > { %v3304_v38 = vor.u32 %v3533_v36, %v3303_v35  ;;  %v3305_v39 = vld [vmem:[%s4544_s14 + $0x84] sm:$0xf0]  ;;  %v3311_v40 = vld [vmem:[%s4544_s14 + $0x80] sm:$0xf]  ;;  %v3534_v41 = vld [vmem:[%s4544_s14 + $0x88] sm:$0xf0] }
  0xa2   : > { %v3803_v3 = vpop.eup %3802  ;;  %v3308_v42 = vor.u32 %v3532_v37, %v3305_v39  ;;  %v3312_v43 = vor.u32 %v3534_v41, %v3311_v40  ;;  %v3291_v44 = vld [vmem:[%s4544_s14 + $0x60] sm:$0xf]  ;;  %v3530_v45 = vld [vmem:[%s4544_s14 + $0x68] sm:$0xf0]  ;;  %v3529_v46 = vld [vmem:[%s4544_s14 + $0x64] sm:$0xf] }
  0xa3   : > { %v756_v4 = vmul.f32 128.0, %v3803_v3  ;;  %vm760_vm0 = vweird.f32 %v3803_v3  ;;  %970 = vmatpush.bf16.msra.mxu0 %v3316_v29  ;;  %v3292_v47 = vor.u32 %v3530_v45, %v3291_v44  ;;  %v3293_v48 = vld [vmem:[%s4544_s14 + $0x6c] sm:$0xf0]  ;;  %v3299_v49 = vld [vmem:[%s4544_s14 + $0x68] sm:$0xf]  ;;  %s4269_s6 = smov 64  }
  0xa4   : > { %753 = vadd.xlane.f32.xlu0 %v748_v1  ;;  %984 = vmatpush.bf16.msra.mxu1 %v3320_v33  ;;  %v3531_v50 = vld [vmem:[%s4544_s14 + $0x70] sm:$0xf0]  ;;  %v3296_v51 = vor.u32 %v3529_v46, %v3293_v48  ;;  %v3279_v53 = vld [vmem:[%s4544_s14 + $0x48] sm:$0xf]  ;;  %v3526_v55 = vld [vmem:[%s4544_s14 + $0x4c] sm:$0xf] }
  0xa5   : > { %v757_v5 = vsub.f32 1.0, %v756_v4  ;;  %998 = vmatpush.bf16.msra.mxu2 %v3324_v34  ;;  %v3300_v52 = vor.u32 %v3531_v50, %v3299_v49  ;;  %v3527_v54 = vld [vmem:[%s4544_s14 + $0x50] sm:$0xf0]  ;;  %v3281_v57 = vld [vmem:[%s4544_s14 + $0x54] sm:$0xf0]  ;;  %vm1766_vm8 = vcmask 261120  }
  0xa6   : > { %v3280_v56 = vor.u32 %v3527_v54, %v3279_v53  ;;  %v3287_v58 = vld [vmem:[%s4544_s14 + $0x50] sm:$0xf]  ;;  %v3528_v59 = vld [vmem:[%s4544_s14 + $0x58] sm:$0xf0]  ;;  %v3284_v60 = vor.u32 %v3526_v55, %v3281_v57  ;;  %v3269_v2 = vld [vmem:[%s4544_s14 + $0x3c] sm:$0xf0] }
  0xa7   : > { %v758_v6 = vmul.f32 %v3803_v3, %v757_v5  ;;  %971 = vmatpush.bf16.msra.mxu0 %v3304_v38  ;;  %v3288_v61 = vor.u32 %v3528_v59, %v3287_v58  ;;  %v3267_v62 = vld [vmem:[%s4544_s14 + $0x30] sm:$0xf]  ;;  %v3524_v63 = vld [vmem:[%s4544_s14 + $0x38] sm:$0xf0]  ;;  %v3525_v4 = vld [vmem:[%s4544_s14 + $0x40] sm:$0xf0] }
  0xa8   : > { %985 = vmatpush.bf16.msra.mxu1 %v3308_v42  ;;  %v3243_v19 = vld [vmem:[%s4544_s14] sm:$0xf]  ;;  %v3518_v20 = vld [vmem:[%s4544_s14 + $0x8] sm:$0xf0]  ;;  %v3517_v21 = vld [vmem:[%s4544_s14 + $0x4] sm:$0xf] }
  0xa9   : > { %v759_v7 = vadd.f32 %v3803_v3, %v758_v6  ;;  %999 = vmatpush.bf16.msra.mxu2 %v3312_v43  ;;  %v3244_v23 = vor.u32 %v3518_v20, %v3243_v19  ;;  %v3245_v24 = vld [vmem:[%s4544_s14 + $0xc] sm:$0xf0]  ;;  %v3251_v25 = vld [vmem:[%s4544_s14 + $0x8] sm:$0xf]  ;;  %v3519_v26 = vld [vmem:[%s4544_s14 + $0x10] sm:$0xf0] }
  0xaa   : > { %v3248_v28 = vor.u32 %v3517_v21, %v3245_v24  ;;  %v3252_v29 = vor.u32 %v3519_v26, %v3251_v25  ;;  %vm1877_vm9 = vcmask 130048   ;;  %vm2332_vm10 = vcmask 523264   ;;  %s5600_s22 = scalar_lea.vmem [#allocation8], %s4534_s5  ;;  %s5605_s20 = sld [smem:[#allocation30_spill]] }
  0xab   : > { %v4611_v8 = vsel %vm760_vm0, %v3803_v3, %v759_v7  ;;  %972 = vmatpush.bf16.msra.mxu0 %v3292_v47  ;;  %v3275_v3 = vld [vmem:[%s4544_s14 + $0x38] sm:$0xf]  ;;  %v3796_v47 = vld [vmem:[%s716_s8] ss:$0 sm:$0xff]  ;;  %s4268_s8 = smov 96   ;;  %vm2335_vm11 = vcmask 785408  }
  0xac   : > { %986 = vmatpush.bf16.msra.mxu1 %v3296_v51  ;;  %v3276_v6 = vor.u32 %v3525_v4, %v3275_v3  ;;  %v3255_v7 = vld [vmem:[%s4544_s14 + $0x18] sm:$0xf]  ;;  %s5606_s27 = sld [smem:[#allocation54_spill]]  ;;  %s2961_s13 = sshll.u32 %s4595_s9, 4  ;;  %s2962_s13 = int_to_ptr.vmem [resolvable:$true] %s2961_s13 }
  0xad   : > { %1000 = vmatpush.bf16.msra.mxu2 %v3300_v52  ;;  %v3797_v52 = vld [vmem:[%s5597_s15] ss:$0 sm:$0xff] }
  0xaf   : > { %973 = vmatpush.bf16.msra.mxu0 %v3280_v56 }
  0xb0   : > { %987 = vmatpush.bf16.msra.mxu1 %v3284_v60 }
  0xb1   : > { %1001 = vmatpush.bf16.msra.mxu2 %v3288_v61 }
  0xb2   : > { %s5607_s4 = smov %s5606_s27 }
  0xb5   : > { %1002 = vmatpush.bf16.msra.mxu2 %v3276_v6 }
 0x10f   : > { %v752_v9 = vpop.xlane.xlu0 %751 }
 0x110   : > { %v762_v10 = vmul.f32 %v4611_v8, %v752_v9  ;;  %v3521_v9 = vld [vmem:[%s4544_s14 + $0x20] sm:$0xf0] }
 0x112   : > { %v4614_v11 = vsub.f32 %v747_v0, %v762_v10  ;;  %v3523_v0 = vld [vmem:[%s4544_s14 + $0x34] sm:$0xf]  ;;  %v3520_v10 = vld [vmem:[%s4544_s14 + $0x1c] sm:$0xf] }
 0x113   : > { %v3272_v5 = vor.u32 %v3523_v0, %v3269_v2 }
 0x114   : > { %v766_v12 = vmul.f32 %v4614_v11, %v4614_v11 }
 0x115   : > { %988 = vmatpush.bf16.msra.mxu1 %v3272_v5 }
 0x116   : > { %768 = vadd.xlane.f32.xlu1 %v766_v12  ;;  %v3256_v12 = vor.u32 %v3521_v9, %v3255_v7 }
 0x117   : > { %v754_v13 = vpop.xlane.xlu0 %753 }
 0x118   : > { %v763_v14 = vmul.f32 %v4611_v8, %v754_v13  ;;  %v3257_v13 = vld [vmem:[%s4544_s14 + $0x24] sm:$0xf0] }
 0x119   : > { %v3260_v17 = vor.u32 %v3520_v10, %v3257_v13 }
 0x11a   : > { %v4619_v15 = vsub.f32 %v748_v1, %v763_v14  ;;  %v3268_v1 = vor.u32 %v3524_v63, %v3267_v62  ;;  %v3263_v14 = vld [vmem:[%s4544_s14 + $0x20] sm:$0xf] }
 0x11b   : > { %989 = vmatpush.bf16.msra.mxu1 %v3260_v17 }
 0x11c   : > { %v767_v16 = vmul.f32 %v4619_v15, %v4619_v15  ;;  %974 = vmatpush.bf16.msra.mxu0 %v3268_v1  ;;  %v4270_v1 = vmov 1983009808  }
 0x11d   : > { %v1037_v2 = vunpack.c.l.s4 %v4270_v1 }
 0x11e   : > { %770 = vadd.xlane.f32.xlu1 %v767_v16  ;;  %v3522_v16 = vld [vmem:[%s4544_s14 + $0x28] sm:$0xf0] }
 0x11f   : > { %v3264_v18 = vor.u32 %v3522_v16, %v3263_v14  ;;  %990 = vmatpush.bf16.msra.mxu1 %v3248_v28  ;;  %v4690_v7 = vunpack.c.0.s8 %v1037_v2 }
 0x120   : > { %975 = vmatpush.bf16.msra.mxu0 %v3256_v12 }
 0x121   : > { %1003 = vmatpush.bf16.msra.mxu2 %v3264_v18 }
 0x124   : > { %976 = vmatpush.bf16.msra.mxu0 %v3244_v23  ;;  %v4271_v23 = vmov 1934713408  }
 0x125   : > { %1004 = vmatpush.bf16.msra.mxu2 %v3252_v29  ;;  %v1061_v24 = vunpack.c.l.s4 %v4271_v23 }
 0x189   : > { %v769_v22 = vpop.xlane.xlu1 %768 }
 0x18a   : > { %v772_v27 = vmul.f32 %v769_v22, %v4611_v8 }
 0x18c   : > { %v774_v30 = vadd.f32 1e-05, %v772_v27 }
 0x18e   : > { %3804 = vrsqrt.f32 %v774_v30  ;;  %vm782_vm2 = vweird.f32 %v774_v30 }
 0x191   : > { %v771_v31 = vpop.xlane.xlu1 %770 }
 0x192   : > { %v773_v32 = vmul.f32 %v771_v31, %v4611_v8 }
 0x194   : > { %v3805_v33 = vpop.eup %3804  ;;  %v775_v34 = vadd.f32 1e-05, %v773_v32 }
 0x195   : > { %v777_v35 = vmul.f32 %v3805_v33, %v774_v30  ;;  %vm783_vm1 = vweird.f32 %v3805_v33 }
 0x196   : > { %3806 = vrsqrt.f32 %v775_v34  ;;  %vm784_vm3 = vmor %vm782_vm2, %vm783_vm1  ;;  %vm792_vm5 = vweird.f32 %v775_v34 }
 0x197   : > { %v778_v36 = vmul.f32 %v3805_v33, %v777_v35 }
 0x199   : > { %v779_v37 = vmul.f32 0.5, %v778_v36 }
 0x19b   : > { %v780_v38 = vsub.f32 1.5, %v779_v37 }
 0x19c   : > { %v3807_v39 = vpop.eup %3806 }
 0x19d   : > { %v781_v40 = vmul.f32 %v3805_v33, %v780_v38  ;;  %v787_v41 = vmul.f32 %v3807_v39, %v775_v34  ;;  %vm793_vm4 = vweird.f32 %v3807_v39 }
 0x19e   : > { %vm794_vm6 = vmor %vm792_vm5, %vm793_vm4 }
 0x19f   : > { %v788_v42 = vmul.f32 %v3807_v39, %v787_v41  ;;  %v785_v43 = vsel %vm784_vm3, %v3805_v33, %v781_v40  ;;  %v4715_v40 = vunpack.c.0.s8 %v1061_v24 }
 0x1a0   : > { %v796_v46 = vmul.f32 %v785_v43, %v4614_v11 }
 0x1a1   : > { %v789_v44 = vmul.f32 0.5, %v788_v42 }
 0x1a2   : > { %v801_v51 = vmul.f32 %v3796_v47, %v796_v46 }
 0x1a3   : > { %v790_v45 = vsub.f32 1.5, %v789_v44 }
 0x1a4   : > { %v806_v54 = vadd.f32 %v3797_v52, %v801_v51 }
 0x1a5   : > { %v791_v48 = vmul.f32 %v3807_v39, %v790_v45 }
 0x1a7   : > { %v795_v49 = vsel %vm794_vm6, %v3807_v39, %v791_v48 }
 0x1a8   : > { %v797_v50 = vmul.f32 %v795_v49, %v4619_v15 }
 0x1aa   : > { %v802_v53 = vmul.f32 %v3796_v47, %v797_v50 }
 0x1ac   : > { %v807_v55 = vadd.f32 %v3797_v52, %v802_v53 }
 0x1ae   : > { %v808_v56 = vpack.c.bf16 %v807_v55, %v806_v54 }
 0x1b0   : > { %977 = vmatmul.bf16.vlgmr.msra.gmra.mxu0 %v808_v56  ;;  %991 = vmatmul.bf16.vlgmr.msra.gmra.mxu1 %v808_v56 }
 0x1b1   : > { %1005 = vmatmul.bf16.vlgmr.msra.gmra.mxu2 %v808_v56 }
 0x22d   : > { %v978_v11 = vpop.f32.mrf.mxu0  ;;  %v992_v57 = vpop.f32.mrf.mxu1 }
 0x22e   : > { %v1282_v3 = vrot.slane %v992_v57, 4  ;;  %v1034_v10 = vrot.slane %v978_v11, 4 }
 0x235   : > { %v980_v58 = vpop.f32.mrf.mxu0  ;;  %v994_v59 = vpop.f32.mrf.mxu1 }
 0x236   : > { %v3746_v60 = vpack.i.bf16 %v994_v59, %v992_v57  ;;  %v3751_v61 = vpack.i.bf16 %v980_v58, %v978_v11  ;;  %v1338_v6 = vrot.slane %v994_v59, 4  ;;  %v1090_v12 = vrot.slane %v980_v58, 4 }
 0x238   : > { %3747 = vrot.lane.b32.xlu0 %v3746_v60, %s4267_s26  ;;  %3737 = vrot.lane.b32.xlu2 %v3746_v60, %s4268_s8 }
 0x239   : > { %3752 = vrot.lane.b32.xlu1 %v3751_v61, %s4268_s8 }
 0x240   : > { %3742 = vrot.lane.b32.xlu2 %v3746_v60, %s4269_s6 }
 0x248   : > { %3757 = vrot.lane.b32.xlu2 %v3751_v61, %s4269_s6 }
 0x250   : > { %3762 = vrot.lane.b32.xlu2 %v3751_v61, %s4267_s26 }
 0x292   : > { %v4688_v15 = vpop.permute.xlu2 %3737 }
 0x293   : > { %v3740_v20 = vunpack.i.h.bf16 %v4688_v15  ;;  %v3739_v21 = vunpack.i.l.bf16 %v4688_v15 }
 0x295   : > { %v1350_v37 = vrot.slane %v3740_v20, 4  ;;  %v1294_v38 = vrot.slane %v3739_v21, 4 }
 0x29a   : > { %v3743_v62 = vpop.permute.xlu2 %3742 }
 0x29b   : > { %v3745_v63 = vunpack.i.h.bf16 %v3743_v62  ;;  %v3744_v0 = vunpack.i.l.bf16 %v3743_v62 }
 0x29d   : > { %v1336_v4 = vrot.slane %v3745_v63, 4  ;;  %v1280_v5 = vrot.slane %v3744_v0, 4  ;;  %v1283_v9 = vsel %vm1032_vm7, %v3744_v0, %v1282_v3  ;;  %v1339_v13 = vsel %vm1032_vm7, %v3745_v63, %v1338_v6 }
 0x29e   : > { %v1291_v22 = vperm.slane %v1283_v9, %v4690_v7  ;;  %v1347_v31 = vperm.slane %v1339_v13, %v4690_v7 }
 0x29f   : > { %v1337_v16 = vsel %vm1032_vm7, %v1336_v4, %v994_v59  ;;  %v1281_v17 = vsel %vm1032_vm7, %v1280_v5, %v992_v57 }
 0x2a0   : > { %v1343_v29 = vperm.slane %v1337_v16, %v4690_v7  ;;  %v1287_v30 = vperm.slane %v1281_v17, %v4690_v7  ;;  %v1318_v39 = vrot.slane %v1291_v22, 4  ;;  %v1374_v43 = vrot.slane %v1347_v31, 4 }
 0x2a2   : > { %v3758_v14 = vpop.permute.xlu2 %3757  ;;  %v1362_v41 = vrot.slane %v1343_v29, 4  ;;  %v1306_v42 = vrot.slane %v1287_v30, 4 }
 0x2a3   : > { %v3760_v18 = vunpack.i.h.bf16 %v3758_v14  ;;  %v3759_v19 = vunpack.i.l.bf16 %v3758_v14 }
 0x2a5   : > { %v1088_v25 = vrot.slane %v3760_v18, 4  ;;  %v1031_v26 = vrot.slane %v3759_v19, 4  ;;  %v1035_v27 = vsel %vm1032_vm7, %v3759_v19, %v1034_v10  ;;  %v1091_v28 = vsel %vm1032_vm7, %v3760_v18, %v1090_v12 }
 0x2a6   : > { %v4710_v35 = vperm.slane %v1035_v27, %v4690_v7  ;;  %v4713_v36 = vperm.slane %v1091_v28, %v4690_v7 }
 0x2a7   : > { %v1089_v32 = vsel %vm1032_vm7, %v1088_v25, %v980_v58  ;;  %v1033_v33 = vsel %vm1032_vm7, %v1031_v26, %v978_v11 }
 0x2a8   : > { %v4707_v34 = vperm.slane %v1089_v32, %v4690_v7  ;;  %v4718_v44 = vperm.slane %v1033_v33, %v4690_v7  ;;  %v1070_v53 = vrot.slane %v4710_v35, 4  ;;  %v1126_v54 = vrot.slane %v4713_v36, 4 }
 0x2aa   : > { %v3748_v45 = vpop.permute.xlu0 %3747  ;;  %v4720_v46 = vpop.permute.xlu2 %3762  ;;  %v1114_v52 = vrot.slane %v4707_v34, 4 }
 0x2ab   : > { %v3750_v47 = vunpack.i.h.bf16 %v3748_v45  ;;  %v3749_v48 = vunpack.i.l.bf16 %v3748_v45  ;;  %v3765_v49 = vunpack.i.h.bf16 %v4720_v46  ;;  %v3764_v50 = vunpack.i.l.bf16 %v4720_v46  ;;  %v3753_v51 = vpop.permute.xlu1 %3752 }
 0x2ac   : > { %v3755_v55 = vunpack.i.h.bf16 %v3753_v51  ;;  %v3754_v15 = vunpack.i.l.bf16 %v3753_v51 }
 0x2ad   : > { %v1348_v56 = vrot.slane %v3750_v47, 4  ;;  %v1292_v11 = vrot.slane %v3749_v48, 4  ;;  %v1295_v57 = vsel %vm1032_vm7, %v3749_v48, %v1294_v38  ;;  %v1351_v58 = vsel %vm1032_vm7, %v3750_v47, %v1350_v37 }
 0x2ae   : > { %v1303_v59 = vperm.slane %v1295_v57, %v4690_v7  ;;  %v1359_v60 = vperm.slane %v1351_v58, %v4690_v7  ;;  %v1100_v61 = vrot.slane %v3765_v49, 4  ;;  %v1044_v0 = vrot.slane %v3764_v50, 4 }
 0x2af   : > { %v1293_v62 = vsel %vm1032_vm7, %v1292_v11, %v3739_v21  ;;  %v1349_v63 = vsel %vm1032_vm7, %v1348_v56, %v3740_v20  ;;  %v1102_v1 = vrot.slane %v3755_v55, 4 }
 0x2b0   : > { %v1299_v2 = vperm.slane %v1293_v62, %v4690_v7  ;;  %v1316_v3 = vrot.slane %v1303_v59, 4  ;;  %v1319_v4 = vsel %vm1032_vm7, %v1303_v59, %v1318_v39  ;;  %v1355_v5 = vperm.slane %v1349_v63, %v4690_v7 }
 0x2b1   : > { %v1327_v6 = vperm.slane %v1319_v4, %v4715_v40  ;;  %v1372_v9 = vrot.slane %v1359_v60, 4  ;;  %v1375_v10 = vsel %vm1032_vm7, %v1359_v60, %v1374_v43  ;;  %v1101_v12 = vsel %vm1032_vm7, %v1100_v61, %v3755_v55 }
 0x2b2   : > { %v1304_v13 = vrot.slane %v1299_v2, 4  ;;  %v1307_v14 = vsel %vm1032_vm7, %v1299_v2, %v1306_v42  ;;  %v1317_v16 = vsel %vm1032_vm7, %v1316_v3, %v1291_v22  ;;  %v1360_v17 = vrot.slane %v1355_v5, 4 }
 0x2b3   : > { %v1315_v18 = vperm.slane %v1307_v14, %v4715_v40  ;;  %v4745_v19 = vperm.slane %v1317_v16, %v4715_v40  ;;  %v4747_v20 = vrot.slane %v1327_v6, 4  ;;  %v1363_v21 = vsel %vm1032_vm7, %v1355_v5, %v1362_v41 }
 0x2b4   : > { %v1305_v23 = vsel %vm1032_vm7, %v1304_v13, %v1287_v30  ;;  %v1361_v24 = vsel %vm1032_vm7, %v1360_v17, %v1343_v29  ;;  %v1371_v25 = vperm.slane %v1363_v21, %v4715_v40  ;;  %v1373_v26 = vsel %vm1032_vm7, %v1372_v9, %v1347_v31 }
 0x2b5   : > { %v1311_v22 = vperm.slane %v1305_v23, %v4715_v40  ;;  %v1330_v27 = vrot.slane %v1315_v18, 4  ;;  %v1332_v28 = vrot.slane %v4745_v19, 4  ;;  %v4758_v32 = vsel %vm1032_vm7, 0.0, %v4747_v20 }
 0x2b6   : > { %v4761_v33 = vperm.slane %v1361_v24, %v4715_v40  ;;  %v4764_v30 = vperm.slane %v1373_v26, %v4715_v40  ;;  %v1383_v29 = vperm.slane %v1375_v10, %v4715_v40  ;;  %v4767_v37 = vrot.slane %v1371_v25, 4 }
 0x2b7   : > { %v1058_v31 = vrot.slane %v4718_v44, 4  ;;  %v1328_v38 = vrot.slane %v1311_v22, 4  ;;  %v1331_v39 = vsel %vm1032_vm7, 0.0, %v1330_v27  ;;  %v1046_v41 = vrot.slane %v3754_v15, 4 }
 0x2b8   : > { %v4772_v42 = vsel %vm1032_vm7, 0.0, %v1332_v28  ;;  %v4776_v43 = vsel %vm1032_vm7, 0.0, %v4767_v37  ;;  %v4778_v45 = vrot.slane %v1383_v29, 4  ;;  %v1408_v47 = vrot.slane %v4758_v32, 4 }
 0x2b9   : > { %v1384_v48 = vrot.slane %v4761_v33, 4  ;;  %v1388_v51 = vrot.slane %v4764_v30, 4  ;;  %v1103_v55 = vsel %vm1032_vm7, %v3765_v49, %v1102_v1  ;;  %v1107_v56 = vperm.slane %v1101_v12, %v4690_v7 }
 0x2ba   : > { %v4787_v11 = vsel %vm1032_vm7, 0.0, %v4778_v45  ;;  %v1397_v57 = vrot.slane %v1331_v39, 4  ;;  %v1111_v58 = vperm.slane %v1103_v55, %v4690_v7  ;;  %v1045_v59 = vsel %vm1032_vm7, %v1044_v0, %v3754_v15 }
 0x2bb   : > { %v1451_v60 = vrot.slane %v4776_v43, 4  ;;  %v1112_v61 = vrot.slane %v1107_v56, 4  ;;  %v1115_v62 = vsel %vm1032_vm7, %v1107_v56, %v1114_v52  ;;  %v1047_v49 = vsel %vm1032_vm7, %v3764_v50, %v1046_v41 }
 0x2bc   : > { %v1123_v63 = vperm.slane %v1115_v62, %v4715_v40  ;;  %v1124_v1 = vrot.slane %v1111_v58, 4  ;;  %v1051_v2 = vperm.slane %v1045_v59, %v4690_v7  ;;  %v1055_v3 = vperm.slane %v1047_v49, %v4690_v7 }
 0x2bd   : > { %v1389_v15 = vsel %vm1032_vm7, 0.0, %v1388_v51  ;;  %v1462_v0 = vrot.slane %v4787_v11, 4  ;;  %v1113_v4 = vsel %vm1032_vm7, %v1112_v61, %v4707_v34  ;;  %v1127_v46 = vsel %vm1032_vm7, %v1111_v58, %v1126_v54 }
 0x2be   : > { %v4809_v50 = vperm.slane %v1113_v4, %v4715_v40  ;;  %v4811_v52 = vrot.slane %v1123_v63, 4  ;;  %v1056_v5 = vrot.slane %v1051_v2, 4  ;;  %v1059_v6 = vsel %vm1032_vm7, %v1051_v2, %v1058_v31 }
 0x2bf   : > { %v1067_v9 = vperm.slane %v1059_v6, %v4715_v40  ;;  %v1068_v10 = vrot.slane %v1055_v3, 4  ;;  %v1071_v12 = vsel %vm1032_vm7, %v1055_v3, %v1070_v53  ;;  %v1125_v34 = vsel %vm1032_vm7, %v1124_v1, %v4713_v36 }
 0x2c0   : > { %v1136_v54 = vrot.slane %v4809_v50, 4  ;;  %v1057_v13 = vsel %vm1032_vm7, %v1056_v5, %v4718_v44  ;;  %v1079_v14 = vperm.slane %v1071_v12, %v4715_v40  ;;  %v1329_v16 = vsel %vm1032_vm7, 0.0, %v1328_v38 }
 0x2c1   : > { %v4827_v17 = vsel %vm1032_vm7, 0.0, %v4811_v52  ;;  %v4830_v18 = vperm.slane %v1057_v13, %v4715_v40  ;;  %v1069_v53 = vsel %vm1032_vm7, %v1068_v10, %v4710_v35  ;;  %v4834_v36 = vrot.slane %v1067_v9, 4 }
 0x2c2   : > { %v4837_v21 = vperm.slane %v1069_v53, %v4715_v40  ;;  %v4839_v44 = vrot.slane %v1079_v14, 4  ;;  %v4842_v23 = vperm.slane %v1125_v34, %v4715_v40  ;;  %v1385_v24 = vsel %vm1032_vm7, 0.0, %v1384_v48 }
 0x2c3   : > { %v1080_v25 = vrot.slane %v4830_v18, 4  ;;  %v4848_v26 = vsel %vm1032_vm7, 0.0, %v4834_v36  ;;  %v1135_v35 = vperm.slane %v1127_v46, %v4715_v40  ;;  %v1392_v28 = vsel %vm1032_vm7, %v1330_v27, %v1311_v22 }
 0x2c4   : > { %v1203_v32 = vrot.slane %v4827_v17, 4  ;;  %v1084_v29 = vrot.slane %v4837_v21, 4  ;;  %v4856_v31 = vsel %vm1032_vm7, 0.0, %v4839_v44  ;;  %v1140_v38 = vrot.slane %v4842_v23, 4 }
 0x2c5   : > { %v4860_v39 = vsel %vm1032_vm7, 0.0, %v1136_v54  ;;  %v4863_v41 = vsel %vm1032_vm7, 0.0, %v1080_v25  ;;  %v1149_v43 = vrot.slane %v4848_v26, 4  ;;  %v1396_v22 = vperm.slane %v1392_v28, %v4690_v7 }
 0x2c6   : > { %v4867_v27 = vrot.slane %v1135_v35, 4  ;;  %v1160_v48 = vrot.slane %v4856_v31, 4  ;;  %v1398_v51 = vsel %vm1032_vm7, %v1397_v57, %v1329_v16  ;;  %v1403_v55 = vsel %vm1032_vm7, %v4747_v20, %v4745_v19 }
 0x2c7   : > { %v4875_v56 = vsel %vm1032_vm7, 0.0, %v1084_v29  ;;  %v4878_v11 = vsel %vm1032_vm7, 0.0, %v1140_v38  ;;  %v1402_v58 = vperm.slane %v1398_v51, %v4690_v7  ;;  %v1409_v59 = vsel %vm1032_vm7, %v1408_v47, %v4772_v42 }
 0x2c8   : > { %v1407_v61 = vperm.slane %v1403_v55, %v4690_v7  ;;  %v1413_v62 = vperm.slane %v1409_v59, %v4690_v7  ;;  %v1416_v57 = vrot.slane %v1396_v22, 4  ;;  %v1446_v19 = vsel %vm1032_vm7, %v4767_v37, %v4761_v33 }
 0x2c9   : > { %v1414_v20 = vrot.slane %v1402_v58, 4  ;;  %v1450_v49 = vperm.slane %v1446_v19, %v4690_v7  ;;  %v1452_v63 = vsel %vm1032_vm7, %v1451_v60, %v1385_v24  ;;  %v1457_v1 = vsel %vm1032_vm7, %v4778_v45, %v4764_v30 }
 0x2ca   : > { %v1426_v2 = vrot.slane %v1413_v62, 4  ;;  %v1456_v42 = vperm.slane %v1452_v63, %v4690_v7  ;;  %v1461_v47 = vperm.slane %v1457_v1, %v4690_v7  ;;  %v1463_v3 = vsel %vm1032_vm7, %v1462_v0, %v1389_v15 }
 0x2cb   : > { %v4898_v4 = vsel %vm1032_vm7, 0.0, %v4867_v27  ;;  %v1415_v33 = vsel %vm1032_vm7, %v1414_v20, %v1396_v22  ;;  %v1467_v37 = vperm.slane %v1463_v3, %v4690_v7  ;;  %v1470_v60 = vrot.slane %v1450_v49, 4 }
 0x2cc   : > { %v1421_v46 = vperm.slane %v1415_v33, %v4715_v40  ;;  %v1427_v30 = vsel %vm1032_vm7, %v1426_v2, %v1407_v61  ;;  %v1468_v45 = vrot.slane %v1456_v42, 4  ;;  %v1417_v5 = vsel %vm1032_vm7, %v1402_v58, %v1416_v57 }
 0x2cd   : > { %v1433_v6 = vperm.slane %v1427_v30, %v4715_v40  ;;  %v1480_v9 = vrot.slane %v1467_v37, 4  ;;  %v4907_v15 = vperm.slane %v1417_v5, %v4715_v40  ;;  %v1428_v0 = vrot.slane %v1407_v61, 4 }
 0x2ce   : > { %v1469_v10 = vsel %vm1032_vm7, %v1468_v45, %v1450_v49  ;;  %v1471_v12 = vsel %vm1032_vm7, %v1456_v42, %v1470_v60  ;;  %v1482_v34 = vrot.slane %v1461_v47, 4  ;;  %v1440_v54 = vrot.slane %v1421_v46, 4 }
 0x2cf   : > { %v1438_v13 = vrot.slane %v1433_v6, 4  ;;  %v1475_v14 = vperm.slane %v1469_v10, %v4715_v40  ;;  %v1481_v16 = vsel %vm1032_vm7, %v1480_v9, %v1461_v47  ;;  %v1429_v53 = vsel %vm1032_vm7, %v1413_v62, %v1428_v0 }
 0x2d0   : > { %v1487_v24 = vperm.slane %v1481_v16, %v4715_v40  ;;  %v4916_v25 = vperm.slane %v1429_v53, %v4715_v40  ;;  %v1444_v35 = vrot.slane %v4907_v15, 4  ;;  %v4920_v28 = vperm.slane %v1471_v12, %v4715_v40 }
 0x2d1   : > { %v1439_v29 = vsel %vm1032_vm7, %v1438_v13, %v1421_v46  ;;  %v1483_v38 = vsel %vm1032_vm7, %v1467_v37, %v1482_v34  ;;  %v1441_v22 = vsel %vm1032_vm7, %v1433_v6, %v1440_v54  ;;  %v1494_v51 = vrot.slane %v1475_v14, 4 }
 0x2d2   : > { %v1214_v55 = vrot.slane %v4898_v4, 4  ;;  %v1492_v58 = vrot.slane %v1487_v24, 4  ;;  %v1500_v59 = vpack.c.bf16 %v1439_v29, %v1439_v29  ;;  %v1445_v61 = vsel %vm1032_vm7, %v4916_v25, %v1444_v35 }
 0x2d3   : > { %v4929_v62 = vperm.slane %v1483_v38, %v4715_v40  ;;  %v1498_v57 = vrot.slane %v4920_v28, 4  ;;  %v1506_v19 = vpack.c.bf16 %v1445_v61, %v1445_v61  ;;  %v1495_v20 = vsel %vm1032_vm7, %v1487_v24, %v1494_v51 }
 0x2d4   : > { %v1493_v49 = vsel %vm1032_vm7, %v1492_v58, %v1475_v14  ;;  %v1502_v63 = vpack.c.bf16 %v1441_v22, %v1441_v22  ;;  %v1503_v1 = vpack.c.bf16 %v1495_v20, %v1495_v20  ;;  %v1763_v42 = vunpack.c.l.b16 %v1500_v59 }
 0x2d5   : > { %v1501_v2 = vpack.c.bf16 %v1493_v49, %v1493_v49  ;;  %v1499_v47 = vsel %vm1032_vm7, %v4929_v62, %v1498_v57  ;;  %v1854_v3 = vunpack.c.l.b16 %v1506_v19  ;;  %v1144_v60 = vsel %vm1032_vm7, %v4834_v36, %v4830_v18 }
 0x2d6   : > { %v1507_v4 = vpack.c.bf16 %v1499_v47, %v1499_v47  ;;  %v1794_v33 = vunpack.c.l.b16 %v1502_v63  ;;  %v1795_v37 = vunpack.c.l.b16 %v1503_v1  ;;  %v1148_v30 = vperm.slane %v1144_v60, %v4690_v7 }
 0x2d7   : > { %v1764_v46 = vunpack.c.l.b16 %v1501_v2  ;;  %v1150_v45 = vsel %vm1032_vm7, %v1149_v43, %v4863_v41  ;;  %v1155_v5 = vsel %vm1032_vm7, %v4839_v44, %v4837_v21  ;;  %v1161_v18 = vsel %vm1032_vm7, %v1160_v48, %v4875_v56 }
 0x2d8   : > { %v1855_v6 = vunpack.c.l.b16 %v1507_v4  ;;  %v1796_v9 = vpack.c.b16 %v1795_v37, %v1794_v33  ;;  %v1154_v0 = vperm.slane %v1150_v45, %v4690_v7  ;;  %v1159_v10 = vperm.slane %v1155_v5, %v4690_v7 }
 0x2d9   : > { %v1765_v12 = vpack.c.b16 %v1764_v46, %v1763_v42  ;;  %v1168_v36 = vrot.slane %v1148_v30, 4  ;;  %v1198_v26 = vsel %vm1032_vm7, %v4811_v52, %v4809_v50  ;;  %v1165_v44 = vperm.slane %v1161_v18, %v4690_v7 }
 0x2da   : > { %v1856_v41 = vpack.c.b16 %v1855_v6, %v1854_v3  ;;  %v1801_v21 = vsel %vm1766_vm8, %v1796_v9, 0  ;;  %v1166_v43 = vrot.slane %v1154_v0, 4  ;;  %v1202_v54 = vperm.slane %v1198_v26, %v4690_v7 }
 0x2db   : > { %v1771_v34 = vsel %vm1766_vm8, %v1765_v12, 0  ;;  %v1204_v31 = vsel %vm1032_vm7, %v1203_v32, %v4860_v39  ;;  %v1209_v48 = vsel %vm1032_vm7, %v4867_v27, %v4842_v23  ;;  %v1442_v50 = vrot.slane %v4916_v25, 4 }
 0x2dc   : > { %1780 = vmatpush.bf16.xpose.msra.mxu3 %v1771_v34  ;;  %v1861_v52 = vsel %vm1766_vm8, %v1856_v41, 0  ;;  %v1178_v56 = vrot.slane %v1165_v44, 4  ;;  %v1208_v13 = vperm.slane %v1204_v31, %v4690_v7  ;;  %v1167_v14 = vsel %vm1032_vm7, %v1166_v43, %v1148_v30 }
 0x2dd   : > { %1870 = vmatpush.bf16.xpose.msrb.mxu0 %v1861_v52  ;;  %v1213_v17 = vperm.slane %v1209_v48, %v4690_v7  ;;  %v1215_v32 = vsel %vm1032_vm7, %v1214_v55, %v4878_v11  ;;  %v1222_v39 = vrot.slane %v1202_v54, 4  ;;  %v1169_v53 = vsel %vm1032_vm7, %v1154_v0, %v1168_v36 }
 0x2de   : > { %v1179_v23 = vsel %vm1032_vm7, %v1178_v56, %v1159_v10  ;;  %v1219_v27 = vperm.slane %v1215_v32, %v4690_v7  ;;  %v1220_v16 = vrot.slane %v1208_v13, 4  ;;  %v1496_v24 = vrot.slane %v4929_v62, 4 }
 0x2df   : > { %v1185_v25 = vperm.slane %v1179_v23, %v4715_v40  ;;  %v1177_v35 = vperm.slane %v1169_v53, %v4715_v40  ;;  %v1180_v29 = vrot.slane %v1159_v10, 4  ;;  %v1173_v38 = vperm.slane %v1167_v14, %v4715_v40 }
 0x2e0   : > { %v1232_v22 = vrot.slane %v1219_v27, 4  ;;  %v1223_v11 = vsel %vm1032_vm7, %v1208_v13, %v1222_v39  ;;  %v1234_v51 = vrot.slane %v1213_v17, 4  ;;  %v1221_v58 = vsel %vm1032_vm7, %v1220_v16, %v1202_v54 }
 0x2e1   : > { %v1190_v55 = vrot.slane %v1185_v25, 4  ;;  %v1181_v59 = vsel %vm1032_vm7, %v1165_v44, %v1180_v29  ;;  %v1196_v61 = vrot.slane %v1177_v35, 4  ;;  %v1231_v19 = vperm.slane %v1223_v11, %v4715_v40 }
 0x2e2   : > { %v1233_v57 = vsel %vm1032_vm7, %v1232_v22, %v1213_v17  ;;  %v1189_v62 = vperm.slane %v1181_v59, %v4715_v40  ;;  %v1235_v20 = vsel %vm1032_vm7, %v1219_v27, %v1234_v51  ;;  %v1227_v3 = vperm.slane %v1221_v58, %v4715_v40  ;;  %v5016_v59 = vpop.f32.mrf.mxu2 }
 0x2e3   : > { %v1191_v49 = vsel %vm1032_vm7, %v1190_v55, %v1173_v38  ;;  %v1239_v63 = vperm.slane %v1233_v57, %v4715_v40  ;;  %v1243_v42 = vperm.slane %v1235_v20, %v4715_v40  ;;  %v1250_v47 = vrot.slane %v1231_v19, 4 }
 0x2e4   : > { %1810 = vmatpush.bf16.xpose.msrb.mxu3 %v1801_v21  ;;  %v1252_v1 = vpack.c.bf16 %v1191_v49, %v1191_v49  ;;  %v1197_v2 = vsel %vm1032_vm7, %v1189_v62, %v1196_v61  ;;  %v1443_v37 = vsel %vm1032_vm7, %v1442_v50, %v4907_v15  ;;  %v1497_v46 = vsel %vm1032_vm7, %v1496_v24, %v4920_v28 }
 0x2e5   : > { %v1244_v4 = vrot.slane %v1239_v63, 4  ;;  %v1258_v33 = vpack.c.bf16 %v1197_v2, %v1197_v2  ;;  %v1251_v60 = vsel %vm1032_vm7, %v1243_v42, %v1250_v47  ;;  %v1504_v30 = vpack.c.bf16 %v1443_v37, %v1443_v37 }
 0x2e6   : > { %v1259_v5 = vpack.c.bf16 %v1251_v60, %v1251_v60  ;;  %v1505_v9 = vpack.c.bf16 %v1497_v46, %v1497_v46  ;;  %v1758_v10 = vunpack.c.l.b16 %v1252_v1  ;;  %v1192_v44 = vrot.slane %v1173_v38, 4 }
 0x2e7   : > { %v1245_v45 = vsel %vm1032_vm7, %v1244_v4, %v1227_v3  ;;  %v1849_v6 = vunpack.c.l.b16 %v1258_v33  ;;  %v1824_v12 = vunpack.c.l.b16 %v1504_v30  ;;  %v1246_v43 = vrot.slane %v1227_v3, 4 }
 0x2e8   : > { %v1253_v0 = vpack.c.bf16 %v1245_v45, %v1245_v45  ;;  %v1850_v18 = vunpack.c.l.b16 %v1259_v5  ;;  %v1825_v36 = vunpack.c.l.b16 %v1505_v9  ;;  %v1193_v34 = vsel %vm1032_vm7, %v1185_v25, %v1192_v44 }
 0x2e9   : > { %v1247_v54 = vsel %vm1032_vm7, %v1239_v63, %v1246_v43  ;;  %v1254_v31 = vpack.c.bf16 %v1193_v34, %v1193_v34  ;;  %v1194_v13 = vrot.slane %v1189_v62, 4  ;;  %v1248_v14 = vrot.slane %v1243_v42, 4 }
 0x2ea   : > { %v1759_v26 = vunpack.c.l.b16 %v1253_v0  ;;  %v1851_v41 = vpack.c.b16 %v1850_v18, %v1849_v6  ;;  %v1826_v21 = vpack.c.b16 %v1825_v36, %v1824_v12  ;;  %v1255_v48 = vpack.c.bf16 %v1247_v54, %v1247_v54  ;;  %v5020_v20 = vpop.f32.mrf.mxu2 }
 0x2eb   : > { %v1789_v50 = vunpack.c.l.b16 %v1254_v31  ;;  %v1195_v17 = vsel %vm1032_vm7, %v1194_v13, %v1177_v35  ;;  %v1249_v32 = vsel %vm1032_vm7, %v1248_v14, %v1231_v19  ;;  %v3776_v49 = vpack.i.bf16 %v5020_v20, %v5016_v59 }
 0x2ec   : > { %v1760_v15 = vpack.c.b16 %v1759_v26, %v1758_v10  ;;  %3340 = vmatmul.msk.bf16.vlgmr.msrb.gmra.mxu0 %vm1766_vm8, %v1851_v41  ;;  %v1831_v28 = vsel %vm1766_vm8, %v1826_v21, 0  ;;  %v1790_v52 = vunpack.c.l.b16 %v1255_v48  ;;  %v1256_v39 = vpack.c.bf16 %v1195_v17, %v1195_v17 }
 0x2ed   : > { %v1257_v23 = vpack.c.bf16 %v1249_v32, %v1249_v32 }
 0x2ee   : > { %3337 = vmatmul.msk.bf16.vlgmr.msra.gmra.mxu3 %vm1766_vm8, %v1760_v15  ;;  %v1791_v56 = vpack.c.b16 %v1790_v52, %v1789_v50  ;;  %v1819_v27 = vunpack.c.l.b16 %v1256_v39 }
 0x2ef   : > { %1840 = vmatpush.bf16.xpose.msra.mxu3 %v1831_v28  ;;  %v1820_v16 = vunpack.c.l.b16 %v1257_v23 }
 0x2f1   : > { %v1821_v53 = vpack.c.b16 %v1820_v16, %v1819_v27 }
 0x2fe   : > { %3338 = vmatmul.msk.bf16.vlgmr.msrb.gmra.mxu3 %vm1766_vm8, %v1791_v56 }
 0x30e   : > { %3339 = vmatmul.msk.bf16.vlgmr.msra.gmra.mxu3 %vm1766_vm8, %v1821_v53 }
 0x369   : > { %v5008_v24 = vpop.f32.mrf.mxu0 }
 0x36a   : > { %v1896_v25 = vsel %vm1877_vm9, %v5008_v24, -inf }
 0x36b   : > { %1897 = vmax.xlane.f32.xlu1 %v1896_v25 }
 0x371   : > { %v1782_v29 = vpop.f32.mrf.mxu3  ;;  %v1874_v38 = vpop.f32.mrf.mxu0 }
 0x372   : > { %v1878_v35 = vsel %vm1877_vm9, %v1782_v29, -inf  ;;  %v1899_v22 = vsel %vm1877_vm9, %v1874_v38, -inf }
 0x373   : > { %1879 = vmax.xlane.f32.xlu2 %v1878_v35  ;;  %1900 = vmax.xlane.f32.xlu0 %v1899_v22 }
 0x379   : > { %v1784_v11 = vpop.f32.mrf.mxu3 }
 0x37a   : > { %v1881_v51 = vsel %vm1877_vm9, %v1784_v11, -inf }
 0x37b   : > { %1882 = vmax.xlane.f32.xlu0 %v1881_v51 }
 0x381   : > { %v1812_v55 = vpop.f32.mrf.mxu3 }
 0x382   : > { %v1884_v58 = vsel %vm1877_vm9, %v1812_v55, -inf }
 0x383   : > { %1885 = vmax.xlane.f32.xlu0 %v1884_v58 }
 0x389   : > { %v1814_v61 = vpop.f32.mrf.mxu3 }
 0x38a   : > { %v1887_v57 = vsel %vm1877_vm9, %v1814_v61, -inf }
 0x38b   : > { %1888 = vmax.xlane.f32.xlu2 %v1887_v57  ;;  %v1530_v57 = vrot.slane %v5016_v59, 4 }
 0x391   : > { %v1842_v62 = vpop.f32.mrf.mxu3 }
 0x392   : > { %v1890_v19 = vsel %vm1877_vm9, %v1842_v62, -inf }
 0x393   : > { %1891 = vmax.xlane.f32.xlu1 %v1890_v19 }
 0x397   : > { %3777 = vrot.lane.b32.xlu0 %v3776_v49, %s4267_s26 }
 0x399   : > { %v1844_v63 = vpop.f32.mrf.mxu3 }
 0x39a   : > { %v1893_v1 = vsel %vm1877_vm9, %v1844_v63, -inf }
 0x39b   : > { %1894 = vmax.xlane.f32.xlu2 %v1893_v1 }
 0x3ac   : > { %3772 = vrot.lane.b32.xlu1 %v3776_v49, %s4269_s6 }
 0x3b3   : > { %3767 = vrot.lane.b32.xlu2 %v3776_v49, %s4268_s8 }
 0x3de   : > { %v1898_v10 = vpop.xlane.xlu1 %1897 }
 0x3df   : > { %v1908_v31 = vsub.f32 %v5008_v24, %v1898_v10 }
 0x3e1   : > { %v1922_v14 = vmul.f32 1.442695, %v1908_v31 }
 0x3e6   : > { %v1880_v2 = vpop.xlane.xlu2 %1879  ;;  %v1901_v47 = vpop.xlane.xlu0 %1900 }
 0x3e7   : > { %v1902_v42 = vsub.f32 %v1782_v29, %v1880_v2  ;;  %v1909_v6 = vsub.f32 %v1874_v38, %v1901_v47 }
 0x3e9   : > { %v1910_v3 = vmul.f32 1.442695, %v1902_v42  ;;  %v1924_v12 = vmul.f32 1.442695, %v1909_v6 }
 0x3eb   : > { %3808 = vpow2.f32 %v1910_v3 }
 0x3ee   : > { %v1883_v4 = vpop.xlane.xlu0 %1882 }
 0x3ef   : > { %v1903_v33 = vsub.f32 %v1784_v11, %v1883_v4 }
 0x3f1   : > { %v5028_v37 = vpop.eup %3808  ;;  %v1912_v60 = vmul.f32 1.442695, %v1903_v33 }
 0x3f2   : > { %v1926_v46 = vsel %vm1877_vm9, %v5028_v37, 0.0 }
 0x3f3   : > { %1927 = vadd.xlane.f32.xlu2 %v1926_v46  ;;  %3810 = vpow2.f32 %v1912_v60 }
 0x3f6   : > { %v1886_v30 = vpop.xlane.xlu0 %1885 }
 0x3f7   : > { %v1904_v45 = vsub.f32 %v1812_v55, %v1886_v30 }
 0x3f9   : > { %v5032_v5 = vpop.eup %3810  ;;  %v1914_v9 = vmul.f32 1.442695, %v1904_v45 }
 0x3fa   : > { %v1929_v0 = vsel %vm1877_vm9, %v5032_v5, 0.0 }
 0x3fb   : > { %3812 = vpow2.f32 %v1914_v9  ;;  %1930 = vadd.xlane.f32.xlu0 %v1929_v0 }
 0x3fc   : > { %3814 = vpow2.f32 %v1924_v12 }
 0x3fe   : > { %v1889_v26 = vpop.xlane.xlu2 %1888 }
 0x3ff   : > { %v1905_v44 = vsub.f32 %v1814_v61, %v1889_v26 }
 0x401   : > { %v5036_v18 = vpop.eup %3812  ;;  %v1916_v34 = vmul.f32 1.442695, %v1905_v44 }
 0x402   : > { %v1932_v36 = vsel %vm1877_vm9, %v5036_v18, 0.0  ;;  %v5040_v15 = vpop.eup %3814 }
 0x403   : > { %1933 = vadd.xlane.f32.xlu0 %v1932_v36  ;;  %v1947_v28 = vsel %vm1877_vm9, %v5040_v15, 0.0 }
 0x406   : > { %v1892_v41 = vpop.xlane.xlu1 %1891 }
 0x407   : > { %v1906_v21 = vsub.f32 %v1842_v62, %v1892_v41  ;;  %v1586_v62 = vrot.slane %v5020_v20, 4 }
 0x409   : > { %v1918_v43 = vmul.f32 1.442695, %v1906_v21  ;;  %v3778_v56 = vpop.permute.xlu0 %3777 }
 0x40a   : > { %v3780_v17 = vunpack.i.h.bf16 %v3778_v56  ;;  %v3779_v32 = vunpack.i.l.bf16 %v3778_v56 }
 0x40b   : > { %3816 = vpow2.f32 %v1918_v43  ;;  %1948 = vadd.xlane.f32.xlu0 %v1947_v28 }
 0x40c   : > { %3818 = vpow2.f32 %v1916_v34  ;;  %v1596_v24 = vrot.slane %v3780_v17, 4  ;;  %v1540_v38 = vrot.slane %v3779_v32, 4 }
 0x40e   : > { %v1895_v54 = vpop.xlane.xlu2 %1894 }
 0x40f   : > { %v1907_v48 = vsub.f32 %v1844_v63, %v1895_v54 }
 0x411   : > { %v5045_v50 = vpop.eup %3816  ;;  %v1920_v52 = vmul.f32 1.442695, %v1907_v48 }
 0x412   : > { %v1938_v13 = vsel %vm1877_vm9, %v5045_v50, 0.0  ;;  %v5049_v23 = vpop.eup %3818 }
 0x413   : > { %3820 = vpow2.f32 %v1920_v52  ;;  %1939 = vadd.xlane.f32.xlu1 %v1938_v13  ;;  %v1935_v35 = vsel %vm1877_vm9, %v5049_v23, 0.0 }
 0x414   : > { %3822 = vpow2.f32 %v1922_v14 }
 0x416   : > { %v3768_v39 = vpop.permute.xlu2 %3767 }
 0x417   : > { %v3770_v27 = vunpack.i.h.bf16 %v3768_v39  ;;  %v3769_v16 = vunpack.i.l.bf16 %v3768_v39 }
 0x419   : > { %v5051_v53 = vpop.eup %3820  ;;  %v1598_v25 = vrot.slane %v3770_v27, 4  ;;  %v1542_v29 = vrot.slane %v3769_v16, 4  ;;  %v1597_v11 = vsel %vm1032_vm7, %v1596_v24, %v3770_v27  ;;  %v1541_v58 = vsel %vm1032_vm7, %v1540_v38, %v3769_v16 }
 0x41a   : > { %v1941_v22 = vsel %vm1877_vm9, %v5051_v53, 0.0  ;;  %v5061_v61 = vpop.eup %3822  ;;  %v1603_v19 = vperm.slane %v1597_v11, %v4690_v7  ;;  %v1547_v2 = vperm.slane %v1541_v58, %v4690_v7 }
 0x41b   : > { %v1543_v51 = vsel %vm1032_vm7, %v3779_v32, %v1542_v29  ;;  %1936 = vadd.xlane.f32.xlu1 %v1935_v35  ;;  %1942 = vadd.xlane.f32.xlu2 %v1941_v22  ;;  %v1599_v55 = vsel %vm1032_vm7, %v3780_v17, %v1598_v25  ;;  %v1944_v3 = vsel %vm1877_vm9, %v5061_v61, 0.0 }
 0x41c   : > { %v1551_v49 = vperm.slane %v1543_v51, %v4690_v7  ;;  %v1607_v1 = vperm.slane %v1599_v55, %v4690_v7  ;;  %v1608_v30 = vrot.slane %v1603_v19, 4  ;;  %v1552_v10 = vrot.slane %v1547_v2, 4 }
 0x41e   : > { %v3773_v63 = vpop.permute.xlu1 %3772  ;;  %v1564_v45 = vrot.slane %v1551_v49, 4  ;;  %v1620_v0 = vrot.slane %v1607_v1, 4 }
 0x41f   : > { %v3775_v42 = vunpack.i.h.bf16 %v3773_v63  ;;  %v3774_v47 = vunpack.i.l.bf16 %v3773_v63 }
 0x421   : > { %v1584_v4 = vrot.slane %v3775_v42, 4  ;;  %v1587_v33 = vsel %vm1032_vm7, %v3775_v42, %v1586_v62  ;;  %v1528_v60 = vrot.slane %v3774_v47, 4  ;;  %v1531_v46 = vsel %vm1032_vm7, %v3774_v47, %v1530_v57 }
 0x422   : > { %v1595_v6 = vperm.slane %v1587_v33, %v4690_v7  ;;  %v1539_v9 = vperm.slane %v1531_v46, %v4690_v7 }
 0x423   : > { %v1585_v12 = vsel %vm1032_vm7, %v1584_v4, %v5020_v20  ;;  %v1529_v36 = vsel %vm1032_vm7, %v1528_v60, %v5016_v59  ;;  %1945 = vadd.xlane.f32.xlu2 %v1944_v3 }
 0x424   : > { %v1591_v26 = vperm.slane %v1585_v12, %v4690_v7  ;;  %v1622_v41 = vrot.slane %v1595_v6, 4  ;;  %v1535_v21 = vperm.slane %v1529_v36, %v4690_v7  ;;  %v1565_v44 = vsel %vm1032_vm7, %v1564_v45, %v1539_v9 }
 0x425   : > { %v1566_v43 = vrot.slane %v1539_v9, 4  ;;  %v1571_v28 = vperm.slane %v1565_v44, %v4715_v40  ;;  %v1621_v34 = vsel %vm1032_vm7, %v1620_v0, %v1595_v6 }
 0x426   : > { %v1610_v54 = vrot.slane %v1591_v26, 4  ;;  %v1553_v31 = vsel %vm1032_vm7, %v1552_v10, %v1535_v21  ;;  %v1554_v20 = vrot.slane %v1535_v21, 4  ;;  %v1609_v48 = vsel %vm1032_vm7, %v1608_v30, %v1591_v26 }
 0x427   : > { %v1559_v59 = vperm.slane %v1553_v31, %v4715_v40  ;;  %v1567_v52 = vsel %vm1032_vm7, %v1551_v49, %v1566_v43  ;;  %v1580_v56 = vrot.slane %v1571_v28, 4  ;;  %v1615_v13 = vperm.slane %v1609_v48, %v4715_v40 }
 0x428   : > { %v1555_v14 = vsel %vm1032_vm7, %v1547_v2, %v1554_v20  ;;  %v1575_v17 = vperm.slane %v1567_v52, %v4715_v40  ;;  %v1611_v32 = vsel %vm1032_vm7, %v1603_v19, %v1610_v54  ;;  %v1623_v39 = vsel %vm1032_vm7, %v1607_v1, %v1622_v41 }
 0x429   : > { %v1563_v27 = vperm.slane %v1555_v14, %v4715_v40  ;;  %v1576_v16 = vrot.slane %v1559_v59, 4  ;;  %v1619_v24 = vperm.slane %v1611_v32, %v4715_v40  ;;  %v1627_v29 = vperm.slane %v1621_v34, %v4715_v40 }
 0x42a   : > { %v1582_v25 = vrot.slane %v1575_v17, 4  ;;  %v1631_v38 = vperm.slane %v1623_v39, %v4715_v40  ;;  %v1632_v35 = vrot.slane %v1615_v13, 4  ;;  %v1581_v51 = vsel %vm1032_vm7, 0.0, %v1580_v56 }
 0x42b   : > { %v1577_v22 = vsel %vm1032_vm7, 0.0, %v1576_v16  ;;  %v1578_v11 = vrot.slane %v1563_v27, 4  ;;  %v1634_v55 = vrot.slane %v1619_v24, 4  ;;  %v1636_v62 = vrot.slane %v1627_v29, 4 }
 0x42c   : > { %v1583_v58 = vsel %vm1032_vm7, 0.0, %v1582_v25  ;;  %v1633_v57 = vsel %vm1032_vm7, 0.0, %v1632_v35  ;;  %v1638_v19 = vrot.slane %v1631_v38, 4  ;;  %v1651_v2 = vsel %vm1032_vm7, %v1582_v25, %v1571_v28 }
 0x42d   : > { %v1579_v49 = vsel %vm1032_vm7, 0.0, %v1578_v11  ;;  %v1635_v63 = vsel %vm1032_vm7, 0.0, %v1634_v55  ;;  %v1640_v1 = vsel %vm1032_vm7, %v1578_v11, %v1559_v59  ;;  %v1637_v42 = vsel %vm1032_vm7, 0.0, %v1636_v62 }
 0x42e   : > { %v1639_v47 = vsel %vm1032_vm7, 0.0, %v1638_v19  ;;  %v1644_v3 = vperm.slane %v1640_v1, %v4690_v7  ;;  %v1645_v4 = vrot.slane %v1579_v49, 4  ;;  %v1655_v33 = vperm.slane %v1651_v2, %v4690_v7 }
 0x42f   : > { %v1656_v60 = vrot.slane %v1583_v58, 4  ;;  %v1694_v46 = vsel %vm1032_vm7, %v1634_v55, %v1615_v13  ;;  %v1699_v30 = vrot.slane %v1635_v63, 4  ;;  %v1705_v9 = vsel %vm1032_vm7, %v1638_v19, %v1627_v29 }
 0x430   : > { %v1646_v45 = vsel %vm1032_vm7, %v1645_v4, %v1577_v22  ;;  %v1698_v6 = vperm.slane %v1694_v46, %v4690_v7  ;;  %v1710_v0 = vrot.slane %v1639_v47, 4  ;;  %v1676_v12 = vrot.slane %v1655_v33, 4 }
 0x431   : > { %v1657_v10 = vsel %vm1032_vm7, %v1656_v60, %v1581_v51  ;;  %v1700_v36 = vsel %vm1032_vm7, %v1699_v30, %v1633_v57  ;;  %v1709_v26 = vperm.slane %v1705_v9, %v4690_v7  ;;  %v1650_v44 = vperm.slane %v1646_v45, %v4690_v7 }
 0x432   : > { %v1661_v41 = vperm.slane %v1657_v10, %v4690_v7  ;;  %v1711_v21 = vsel %vm1032_vm7, %v1710_v0, %v1637_v42  ;;  %v1664_v43 = vrot.slane %v1644_v3, 4  ;;  %v1704_v54 = vperm.slane %v1700_v36, %v4690_v7 }
 0x433   : > { %v1715_v28 = vperm.slane %v1711_v21, %v4690_v7  ;;  %v1730_v34 = vrot.slane %v1709_v26, 4  ;;  %v1718_v31 = vrot.slane %v1698_v6, 4  ;;  %v1662_v59 = vrot.slane %v1650_v44, 4 }
 0x434   : > { %v1665_v20 = vsel %vm1032_vm7, %v1650_v44, %v1664_v43  ;;  %v1677_v48 = vsel %vm1032_vm7, %v1661_v41, %v1676_v12  ;;  %v1674_v52 = vrot.slane %v1661_v41, 4  ;;  %v1716_v38 = vrot.slane %v1704_v54, 4 }
 0x435   : > { %v1673_v56 = vperm.slane %v1665_v20, %v4715_v40  ;;  %v1685_v13 = vperm.slane %v1677_v48, %v4715_v40  ;;  %v1719_v14 = vsel %vm1032_vm7, %v1704_v54, %v1718_v31  ;;  %v1731_v17 = vsel %vm1032_vm7, %v1715_v28, %v1730_v34 }
 0x436   : > { %v1727_v32 = vperm.slane %v1719_v14, %v4715_v40  ;;  %v1739_v39 = vperm.slane %v1731_v17, %v4715_v40  ;;  %v1663_v27 = vsel %vm1032_vm7, %v1662_v59, %v1644_v3  ;;  %v1675_v16 = vsel %vm1032_vm7, %v1674_v52, %v1655_v33 }
 0x437   : > { %v1690_v24 = vrot.slane %v1685_v13, 4  ;;  %v1669_v25 = vperm.slane %v1663_v27, %v4715_v40  ;;  %v1681_v29 = vperm.slane %v1675_v16, %v4715_v40  ;;  %v1728_v22 = vrot.slane %v1715_v28, 4 }
 0x438   : > { %v1744_v35 = vrot.slane %v1739_v39, 4  ;;  %v1692_v11 = vrot.slane %v1673_v56, 4  ;;  %v1746_v51 = vrot.slane %v1727_v32, 4  ;;  %v1717_v62 = vsel %vm1032_vm7, %v1716_v38, %v1698_v6 }
 0x439   : > { %v1691_v55 = vsel %vm1032_vm7, %v1690_v24, %v1673_v56  ;;  %v1686_v58 = vrot.slane %v1681_v29, 4  ;;  %v1688_v57 = vrot.slane %v1669_v25, 4  ;;  %v1723_v63 = vperm.slane %v1717_v62, %v4715_v40 }
 0x43a   : > { %v1745_v19 = vsel %vm1032_vm7, %v1744_v35, %v1727_v32  ;;  %v1752_v49 = vpack.c.bf16 %v1691_v55, %v1691_v55  ;;  %v1729_v1 = vsel %vm1032_vm7, %v1728_v22, %v1709_v26  ;;  %v1693_v3 = vsel %vm1032_vm7, %v1685_v13, %v1692_v11 }
 0x43b   : > { %v1753_v2 = vpack.c.bf16 %v1745_v19, %v1745_v19  ;;  %v1687_v42 = vsel %vm1032_vm7, %v1686_v58, %v1669_v25  ;;  %v1735_v47 = vperm.slane %v1729_v1, %v4715_v40  ;;  %v1742_v33 = vrot.slane %v1723_v63, 4 }
 0x43c   : > { %v2037_v4 = vunpack.c.l.b16 %v1752_v49  ;;  %v1748_v60 = vpack.c.bf16 %v1687_v42, %v1687_v42  ;;  %v1747_v46 = vsel %vm1032_vm7, %v1739_v39, %v1746_v51  ;;  %v1754_v6 = vpack.c.bf16 %v1693_v3, %v1693_v3 }
 0x43d   : > { %v2038_v30 = vunpack.c.l.b16 %v1753_v2  ;;  %v1740_v45 = vrot.slane %v1735_v47, 4  ;;  %v1755_v9 = vpack.c.bf16 %v1747_v46, %v1747_v46  ;;  %v1689_v0 = vsel %vm1032_vm7, %v1681_v29, %v1688_v57 }
 0x43e   : > { %v1743_v10 = vsel %vm1032_vm7, %v1735_v47, %v1742_v33  ;;  %v2065_v26 = vunpack.c.l.b16 %v1754_v6  ;;  %v1981_v44 = vunpack.c.l.b16 %v1748_v60  ;;  %v1750_v43 = vpack.c.bf16 %v1689_v0, %v1689_v0 }
 0x43f   : > { %v2039_v12 = vpack.c.b16 %v2038_v30, %v2037_v4  ;;  %v1741_v36 = vsel %vm1032_vm7, %v1740_v45, %v1723_v63  ;;  %v2066_v41 = vunpack.c.l.b16 %v1755_v9  ;;  %v1751_v28 = vpack.c.bf16 %v1743_v10, %v1743_v10 }
 0x440   : > { %v1749_v21 = vpack.c.bf16 %v1741_v36, %v1741_v36  ;;  %v2009_v31 = vunpack.c.l.b16 %v1750_v43 }
 0x441   : > { %2051 = vmatpush.bf16.msrb.mxu3 %v2039_v12  ;;  %v2067_v34 = vpack.c.b16 %v2066_v41, %v2065_v26  ;;  %v2010_v20 = vunpack.c.l.b16 %v1751_v28 }
 0x442   : > { %v1982_v54 = vunpack.c.l.b16 %v1749_v21 }
 0x443   : > { %2079 = vmatpush.bf16.msra.mxu0 %v2067_v34  ;;  %v2011_v59 = vpack.c.b16 %v2010_v20, %v2009_v31 }
 0x444   : > { %v1983_v48 = vpack.c.b16 %v1982_v54, %v1981_v44 }
 0x446   : > { %1995 = vmatpush.bf16.msrb.mxu2 %v1983_v48 }
 0x44a   : > { %2023 = vmatpush.bf16.msra.mxu2 %v2011_v59 }
 0x466   : > { %v1928_v52 = vpop.xlane.xlu2 %1927 }
 0x467   : > { %3824 = vrcp.f32 %v1928_v52 }
 0x46d   : > { %v3825_v13 = vpop.eup %3824 }
 0x46e   : > { %v1931_v56 = vpop.xlane.xlu0 %1930  ;;  %v1958_v14 = vmul.f32 %v3825_v13, %v5028_v37 }
 0x46f   : > { %3826 = vrcp.f32 %v1931_v56 }
 0x470   : > { %v1966_v32 = vpack.c.bf16 %v1958_v14, %v1958_v14 }
 0x472   : > { %v1976_v16 = vunpack.c.l.b16 %v1966_v32 }
 0x475   : > { %v3827_v17 = vpop.eup %3826 }
 0x476   : > { %v1959_v39 = vmul.f32 %v3827_v17, %v5032_v5  ;;  %v1934_v29 = vpop.xlane.xlu0 %1933 }
 0x477   : > { %3828 = vrcp.f32 %v1934_v29 }
 0x478   : > { %v1967_v27 = vpack.c.bf16 %v1959_v39, %v1959_v39 }
 0x47a   : > { %v1977_v24 = vunpack.c.l.b16 %v1967_v27 }
 0x47c   : > { %v1978_v25 = vpack.c.b16 %v1977_v24, %v1976_v16 }
 0x47d   : > { %v3829_v51 = vpop.eup %3828 }
 0x47e   : > { %3341 = vmatmul.msk.bf16.vlgmr.msrb.gmra.mxu2 %vm1877_vm9, %v1978_v25  ;;  %v1949_v35 = vpop.xlane.xlu0 %1948  ;;  %v1960_v5 = vmul.f32 %v3829_v51, %v5036_v18 }
 0x480   : > { %v1968_v62 = vpack.c.bf16 %v1960_v5, %v1960_v5 }
 0x482   : > { %v2004_v3 = vunpack.c.l.b16 %v1968_v62 }
 0x486   : > { %v1940_v38 = vpop.xlane.xlu1 %1939 }
 0x487   : > { %3830 = vrcp.f32 %v1940_v38 }
 0x48d   : > { %v3831_v37 = vpop.eup %3830 }
 0x48e   : > { %v1937_v22 = vpop.xlane.xlu1 %1936  ;;  %v1943_v11 = vpop.xlane.xlu2 %1942  ;;  %v1962_v55 = vmul.f32 %v3831_v37, %v5045_v50 }
 0x48f   : > { %3832 = vrcp.f32 %v1937_v22 }
 0x490   : > { %3834 = vrcp.f32 %v1943_v11  ;;  %v1970_v1 = vpack.c.bf16 %v1962_v55, %v1962_v55 }
 0x491   : > { %3836 = vrcp.f32 %v1949_v35 }
 0x492   : > { %v2032_v18 = vunpack.c.l.b16 %v1970_v1 }
 0x495   : > { %v3833_v58 = vpop.eup %3832 }
 0x496   : > { %v3835_v57 = vpop.eup %3834  ;;  %v1961_v19 = vmul.f32 %v3833_v58, %v5049_v23  ;;  %v1946_v49 = vpop.xlane.xlu2 %1945 }
 0x497   : > { %v3837_v63 = vpop.eup %3836  ;;  %v1963_v2 = vmul.f32 %v3835_v57, %v5051_v53  ;;  %3838 = vrcp.f32 %v1946_v49 }
 0x498   : > { %v1969_v42 = vpack.c.bf16 %v1961_v19, %v1961_v19  ;;  %v1965_v4 = vmul.f32 %v3837_v63, %v5040_v15 }
 0x499   : > { %v1971_v47 = vpack.c.bf16 %v1963_v2, %v1963_v2 }
 0x49a   : > { %v2005_v33 = vunpack.c.l.b16 %v1969_v42  ;;  %v1973_v45 = vpack.c.bf16 %v1965_v4, %v1965_v4 }
 0x49b   : > { %v2033_v60 = vunpack.c.l.b16 %v1971_v47 }
 0x49c   : > { %v2006_v50 = vpack.c.b16 %v2005_v33, %v2004_v3  ;;  %v2061_v6 = vunpack.c.l.b16 %v1973_v45 }
 0x49d   : > { %v3839_v46 = vpop.eup %3838  ;;  %v2034_v30 = vpack.c.b16 %v2033_v60, %v2032_v18 }
 0x49e   : > { %v1964_v23 = vmul.f32 %v3839_v46, %v5061_v61  ;;  %3342 = vmatmul.msk.bf16.vlgmr.msra.gmra.mxu2 %vm1877_vm9, %v2006_v50 }
 0x49f   : > { %3343 = vmatmul.msk.bf16.vlgmr.msrb.gmra.mxu3 %vm1877_vm9, %v2034_v30 }
 0x4a0   : > { %v1972_v53 = vpack.c.bf16 %v1964_v23, %v1964_v23 }
 0x4a2   : > { %v2060_v9 = vunpack.c.l.b16 %v1972_v53 }
 0x4a4   : > { %v2062_v0 = vpack.c.b16 %v2061_v6, %v2060_v9 }
 0x4a6   : > { %3344 = vmatmul.msk.bf16.vlgmr.msra.gmra.mxu0 %vm1877_vm9, %v2062_v0 }
 0x501   : > { %v1997_v15 = vpop.f32.mrf.mxu2 }
 0x502   : > { %v2088_v12 = vrot.slane %v1997_v15, 4 }
 0x509   : > { %v1999_v10 = vpop.f32.mrf.mxu2 }
 0x50a   : > { %v2144_v16 = vrot.slane %v1999_v10, 4 }
 0x521   : > { %v2025_v36 = vpop.f32.mrf.mxu2 }
 0x522   : > { %v2100_v26 = vrot.slane %v2025_v36, 4  ;;  %v2053_v41 = vpop.f32.mrf.mxu3 }
 0x523   : > { %v2086_v21 = vrot.slane %v2053_v41, 4  ;;  %v2089_v44 = vsel %vm1032_vm7, %v2053_v41, %v2088_v12  ;;  %v2081_v61 = vpop.f32.mrf.mxu0 }
 0x524   : > { %v2097_v43 = vperm.slane %v2089_v44, %v4690_v7  ;;  %v2098_v28 = vrot.slane %v2081_v61, 4  ;;  %v2101_v34 = vsel %vm1032_vm7, %v2081_v61, %v2100_v26 }
 0x525   : > { %v2087_v54 = vsel %vm1032_vm7, %v2086_v21, %v1997_v15  ;;  %v2109_v31 = vperm.slane %v2101_v34, %v4690_v7 }
 0x526   : > { %v2093_v20 = vperm.slane %v2087_v54, %v4690_v7  ;;  %v2124_v48 = vrot.slane %v2097_v43, 4  ;;  %v2099_v59 = vsel %vm1032_vm7, %v2098_v28, %v2025_v36 }
 0x527   : > { %v2105_v52 = vperm.slane %v2099_v59, %v4690_v7  ;;  %v2122_v56 = vrot.slane %v2109_v31, 4 }
 0x528   : > { %v2112_v13 = vrot.slane %v2093_v20, 4  ;;  %v2125_v14 = vsel %vm1032_vm7, %v2109_v31, %v2124_v48 }
 0x529   : > { %v2110_v17 = vrot.slane %v2105_v52, 4  ;;  %v2123_v32 = vsel %vm1032_vm7, %v2122_v56, %v2097_v43  ;;  %v2133_v39 = vperm.slane %v2125_v14, %v4715_v40  ;;  %v2027_v27 = vpop.f32.mrf.mxu2 }
 0x52a   : > { %v2113_v24 = vsel %vm1032_vm7, %v2105_v52, %v2112_v13  ;;  %v2129_v25 = vperm.slane %v2123_v32, %v4715_v40  ;;  %v2156_v29 = vrot.slane %v2027_v27, 4  ;;  %v2055_v38 = vpop.f32.mrf.mxu3 }
 0x52b   : > { %v2111_v35 = vsel %vm1032_vm7, %v2110_v17, %v2093_v20  ;;  %v2121_v22 = vperm.slane %v2113_v24, %v4715_v40  ;;  %v2140_v11 = vrot.slane %v2133_v39, 4  ;;  %v2142_v51 = vrot.slane %v2055_v38, 4  ;;  %v2083_v37 = vpop.f32.mrf.mxu0 }
 0x52c   : > { %v2117_v5 = vperm.slane %v2111_v35, %v4715_v40  ;;  %v2138_v55 = vrot.slane %v2129_v25, 4  ;;  %v2145_v58 = vsel %vm1032_vm7, %v2055_v38, %v2144_v16  ;;  %v2154_v57 = vrot.slane %v2083_v37, 4 }
 0x52d   : > { %v2136_v62 = vrot.slane %v2121_v22, 4  ;;  %v2141_v19 = vsel %vm1032_vm7, 0.0, %v2140_v11  ;;  %v2209_v49 = vsel %vm1032_vm7, %v2140_v11, %v2129_v25  ;;  %v2143_v63 = vsel %vm1032_vm7, %v2142_v51, %v1999_v10 }
 0x52e   : > { %v2134_v1 = vrot.slane %v2117_v5, 4  ;;  %v2139_v2 = vsel %vm1032_vm7, 0.0, %v2138_v55  ;;  %v2213_v42 = vperm.slane %v2209_v49, %v4690_v7  ;;  %v2214_v47 = vrot.slane %v2141_v19, 4 }
 0x52f   : > { %v2137_v3 = vsel %vm1032_vm7, 0.0, %v2136_v62  ;;  %v2198_v4 = vsel %vm1032_vm7, %v2136_v62, %v2117_v5  ;;  %v2149_v33 = vperm.slane %v2143_v63, %v4690_v7  ;;  %v2153_v18 = vperm.slane %v2145_v58, %v4690_v7 }
 0x530   : > { %v2203_v60 = vrot.slane %v2137_v3, 4  ;;  %v2215_v50 = vsel %vm1032_vm7, %v2214_v47, %v2139_v2  ;;  %v2234_v46 = vrot.slane %v2213_v42, 4  ;;  %v2155_v30 = vsel %vm1032_vm7, %v2154_v57, %v2027_v27 }
 0x531   : > { %v2219_v45 = vperm.slane %v2215_v50, %v4690_v7  ;;  %v2168_v23 = vrot.slane %v2149_v33, 4  ;;  %v2180_v53 = vrot.slane %v2153_v18, 4  ;;  %v2157_v6 = vsel %vm1032_vm7, %v2083_v37, %v2156_v29 }
 0x532   : > { %v2161_v9 = vperm.slane %v2155_v30, %v4690_v7  ;;  %v2165_v0 = vperm.slane %v2157_v6, %v4690_v7  ;;  %v2135_v15 = vsel %vm1032_vm7, 0.0, %v2134_v1  ;;  %v2202_v10 = vperm.slane %v2198_v4, %v4690_v7 }
 0x533   : > { %v2204_v12 = vsel %vm1032_vm7, %v2203_v60, %v2135_v15  ;;  %v2235_v36 = vsel %vm1032_vm7, %v2219_v45, %v2234_v46  ;;  %v2232_v26 = vrot.slane %v2219_v45, 4 }
 0x534   : > { %v2166_v41 = vrot.slane %v2161_v9, 4  ;;  %v2169_v21 = vsel %vm1032_vm7, %v2161_v9, %v2168_v23  ;;  %v2178_v44 = vrot.slane %v2165_v0, 4  ;;  %v2181_v61 = vsel %vm1032_vm7, %v2165_v0, %v2180_v53 }
 0x535   : > { %v2177_v43 = vperm.slane %v2169_v21, %v4715_v40  ;;  %v2189_v28 = vperm.slane %v2181_v61, %v4715_v40  ;;  %v2208_v34 = vperm.slane %v2204_v12, %v4690_v7  ;;  %v2222_v54 = vrot.slane %v2202_v10, 4 }
 0x536   : > { %v2167_v31 = vsel %vm1032_vm7, %v2166_v41, %v2149_v33  ;;  %v2179_v20 = vsel %vm1032_vm7, %v2178_v44, %v2153_v18  ;;  %v2233_v48 = vsel %vm1032_vm7, %v2232_v26, %v2213_v42  ;;  %v2243_v17 = vperm.slane %v2235_v36, %v4715_v40 }
 0x537   : > { %v2173_v59 = vperm.slane %v2167_v31, %v4715_v40  ;;  %v2185_v52 = vperm.slane %v2179_v20, %v4715_v40  ;;  %v2192_v56 = vrot.slane %v2177_v43, 4  ;;  %v2196_v13 = vrot.slane %v2189_v28, 4  ;;  %v3546_v31 = vld [vmem:[%s4551_s0 + $0x28] sm:$0xff]  ;;  %v3545_v20 = vld [vmem:[%s4551_s0 + $0x20] sm:$0xff] }
 0x538   : > { %v2223_v14 = vsel %vm1032_vm7, %v2208_v34, %v2222_v54  ;;  %v2220_v32 = vrot.slane %v2208_v34, 4  ;;  %v2239_v39 = vperm.slane %v2233_v48, %v4715_v40  ;;  %v2248_v33 = vrot.slane %v2243_v17, 4  ;;  %v3548_v34 = vld [vmem:[%s4551_s0 + $0x38] sm:$0xff]  ;;  %v3547_v54 = vld [vmem:[%s4551_s0 + $0x30] sm:$0xff] }
 0x539   : > { %v2190_v27 = vrot.slane %v2173_v59, 4  ;;  %v2193_v16 = vsel %vm1032_vm7, 0.0, %v2192_v56  ;;  %v2194_v24 = vrot.slane %v2185_v52, 4  ;;  %v2197_v25 = vsel %vm1032_vm7, 0.0, %v2196_v13  ;;  %2407 = vmatpush.bf16.msrb.mxu1 %v3548_v34  ;;  %v3544_v48 = vld [vmem:[%s4551_s0 + $0x18] sm:$0xff] }
 0x53a   : > { %v2252_v29 = vsel %vm1032_vm7, %v2192_v56, %v2173_v59  ;;  %v2257_v38 = vrot.slane %v2193_v16, 4  ;;  %v2263_v35 = vsel %vm1032_vm7, %v2196_v13, %v2185_v52  ;;  %v2268_v22 = vrot.slane %v2197_v25, 4  ;;  %v3543_v59 = vld [vmem:[%s4551_s0 + $0x10] sm:$0xff]  ;;  %v3542_v52 = vld [vmem:[%s4551_s0 + $0x8] sm:$0xff]  ;;  %v3541_v56 = vld [vmem:[%s4551_s0] sm:$0xff]  ;;  %s4138_s0 = scalar_lea.hbm %s5607_s4, 32 }
 0x53b   : > { %v2195_v11 = vsel %vm1032_vm7, 0.0, %v2194_v24  ;;  %v2267_v51 = vperm.slane %v2263_v35, %v4690_v7  ;;  %v2191_v37 = vsel %vm1032_vm7, 0.0, %v2190_v27  ;;  %v2231_v5 = vperm.slane %v2223_v14, %v4715_v40  ;;  %v3413_v34 = vld [vmem:[%s4560_s30 + $0x48] sm:$0xf0] }
 0x53c   : > { %v2269_v55 = vsel %vm1032_vm7, %v2268_v22, %v2195_v11  ;;  %v2256_v58 = vperm.slane %v2252_v29, %v4690_v7  ;;  %v2258_v57 = vsel %vm1032_vm7, %v2257_v38, %v2191_v37  ;;  %v2221_v62 = vsel %vm1032_vm7, %v2220_v32, %v2202_v10 }
 0x53d   : > { %v2273_v19 = vperm.slane %v2269_v55, %v4690_v7  ;;  %v2288_v49 = vrot.slane %v2267_v51, 4  ;;  %v2262_v63 = vperm.slane %v2258_v57, %v4690_v7  ;;  %v2227_v2 = vperm.slane %v2221_v62, %v4715_v40  ;;  %2408 = vmatpush.bf16.msrb.mxu1 %v3547_v54  ;;  %v3852_v57 = vld [vmem:[%s4595_s9] sm:$0xff] }
 0x53e   : > { %v2276_v1 = vrot.slane %v2256_v58, 4  ;;  %v2244_v42 = vrot.slane %v2239_v39, 4  ;;  %v2250_v50 = vrot.slane %v2231_v5, 4  ;;  %v2249_v15 = vsel %vm1032_vm7, %v2248_v33, %v2231_v5  ;;  %v3798_v5 = vld [vmem:[%s719_s18] ss:$0 sm:$0xff] }
 0x53f   : > { %v2289_v47 = vsel %vm1032_vm7, %v2273_v19, %v2288_v49  ;;  %v2274_v3 = vrot.slane %v2262_v63, 4  ;;  %v2286_v4 = vrot.slane %v2273_v19, 4  ;;  %v2246_v53 = vrot.slane %v2227_v2, 4 }
 0x540   : > { %v2277_v18 = vsel %vm1032_vm7, %v2262_v63, %v2276_v1  ;;  %v2297_v60 = vperm.slane %v2289_v47, %v4715_v40  ;;  %v2245_v45 = vsel %vm1032_vm7, %v2244_v42, %v2227_v2  ;;  %v2251_v41 = vsel %vm1032_vm7, %v2243_v17, %v2250_v50  ;;  %v3853_v63 = vld [vmem:[%s4595_s9 + $0x8] sm:$0xff] }
 0x541   : > { %v2285_v46 = vperm.slane %v2277_v18, %v4715_v40  ;;  %v2275_v30 = vsel %vm1032_vm7, %v2274_v3, %v2256_v58  ;;  %v2287_v7 = vsel %vm1032_vm7, %v2286_v4, %v2267_v51  ;;  %2409 = vmatpush.bf16.msrb.mxu1 %v3546_v31  ;;  %v3435_v50 = vld [vmem:[%s4560_s30 + $0x70] sm:$0xf] }
 0x542   : > { %v2302_v23 = vrot.slane %v2297_v60, 4  ;;  %v2281_v6 = vperm.slane %v2275_v30, %v4715_v40  ;;  %v2293_v9 = vperm.slane %v2287_v7, %v4715_v40  ;;  %v2247_v40 = vsel %vm1032_vm7, %v2239_v39, %v2246_v53  ;;  %v3563_v30 = vld [vmem:[%s4560_s30 + $0x74] sm:$0xf]  ;;  %v3427_v53 = vld [vmem:[%s4560_s30 + $0x60] sm:$0xf] }
 0x543   : > { %v2304_v0 = vrot.slane %v2285_v46, 4  ;;  %v3403_v31 = vld [vmem:[%s4560_s30 + $0x30] sm:$0xf] }
 0x544   : > { %v2303_v10 = vsel %vm1032_vm7, %v2302_v23, %v2285_v46  ;;  %v2298_v12 = vrot.slane %v2293_v9, 4  ;;  %v2300_v36 = vrot.slane %v2281_v6, 4  ;;  %v3564_v46 = vld [vmem:[%s4560_s30 + $0x74] sm:$0xf0] }
 0x545   : > { %v3786_v26 = vpack.i.bf16 %v2303_v10, %v2249_v15  ;;  %v2305_v21 = vsel %vm1032_vm7, %v2297_v60, %v2304_v0  ;;  %2410 = vmatpush.bf16.msrb.mxu1 %v3545_v20  ;;  %v3436_v7 = vor.u32 %v3564_v46, %v3435_v50  ;;  %v3429_v15 = vld [vmem:[%s4560_s30 + $0x68] sm:$0xf0]  ;;  %v3556_v20 = vld [vmem:[%s4560_s30 + $0x34] sm:$0xf0] }
 0x546   : > { %v3791_v44 = vpack.i.bf16 %v2305_v21, %v2251_v41  ;;  %v2301_v61 = vsel %vm1032_vm7, %v2293_v9, %v2300_v36  ;;  %v2299_v43 = vsel %vm1032_vm7, %v2298_v12, %v2281_v6  ;;  %v3562_v6 = vld [vmem:[%s4560_s30 + $0x64] sm:$0xf0]  ;;  %v3561_v9 = vld [vmem:[%s4560_s30 + $0x64] sm:$0xf]  ;;  %v3419_v12 = vld [vmem:[%s4560_s30 + $0x50] sm:$0xf] }
 0x547   : > { %3787 = vrot.lane.b32.xlu2 %v3786_v26, %s4269_s6  ;;  %v3781_v28 = vpack.i.bf16 %v2301_v61, %v2247_v40  ;;  %2578 = vmatpush.bf16.msrb.mxu2 %v3436_v7  ;;  %v3428_v0 = vor.u32 %v3562_v6, %v3427_v53  ;;  %v3432_v10 = vor.u32 %v3561_v9, %v3429_v15  ;;  %v3560_v36 = vld [vmem:[%s4560_s30 + $0x54] sm:$0xf0]  ;;  %v3559_v26 = vld [vmem:[%s4560_s30 + $0x54] sm:$0xf]  ;;  %v3421_v21 = vld [vmem:[%s4560_s30 + $0x58] sm:$0xf0] }
 0x548   : > { %3792 = vrot.lane.b32.xlu0 %v3791_v44, %s4268_s8  ;;  %v3420_v41 = vor.u32 %v3560_v36, %v3419_v12  ;;  %v3424_v44 = vor.u32 %v3559_v26, %v3421_v21  ;;  %v3411_v40 = vld [vmem:[%s4560_s30 + $0x40] sm:$0xf]  ;;  %v3558_v61 = vld [vmem:[%s4560_s30 + $0x44] sm:$0xf0]  ;;  %v3799_v6 = vld [vmem:[%s722_s7] ss:$0 sm:$0xff] }
 0x549   : > { %3782 = vrot.lane.b32.xlu1 %v3781_v28, %s4267_s26  ;;  %2411 = vmatpush.bf16.msrb.mxu1 %v3544_v48  ;;  %v3412_v28 = vor.u32 %v3558_v61, %v3411_v40  ;;  %v3555_v48 = vld [vmem:[%s4560_s30 + $0x34] sm:$0xf]  ;;  %v3800_v12 = vld [vmem:[%s5600_s22] ss:$0 sm:$0xff] }
 0x54b   : > { %2579 = vmatpush.bf16.msrb.mxu2 %v3428_v0 }
 0x54d   : > { %2412 = vmatpush.bf16.msrb.mxu1 %v3543_v59  ;;  %v3404_v59 = vor.u32 %v3556_v20, %v3403_v31 }
 0x54f   : > { %2580 = vmatpush.bf16.msrb.mxu2 %v3420_v41 }
 0x551   : > { %2413 = vmatpush.bf16.msrb.mxu1 %v3542_v52  ;;  %v3405_v52 = vld [vmem:[%s4560_s30 + $0x38] sm:$0xf0] }
 0x553   : > { %2581 = vmatpush.bf16.msrb.mxu2 %v3412_v28 }
 0x555   : > { %2414 = vmatpush.bf16.msrb.mxu1 %v3541_v56  ;;  %v3395_v56 = vld [vmem:[%s4560_s30 + $0x20] sm:$0xf] }
 0x557   : > { %2582 = vmatpush.bf16.msrb.mxu2 %v3404_v59 }
 0x5a1   : > { %v3788_v13 = vpop.permute.xlu2 %3787 }
 0x5a2   : > { %v3790_v27 = vunpack.i.h.bf16 %v3788_v13  ;;  %v3789_v16 = vunpack.i.l.bf16 %v3788_v13  ;;  %v3554_v13 = vld [vmem:[%s4560_s30 + $0x24] sm:$0xf0] }
 0x5ba   : > { %v3793_v14 = vpop.permute.xlu0 %3792 }
 0x5bb   : > { %v3783_v17 = vpop.permute.xlu1 %3782  ;;  %v3795_v24 = vunpack.i.h.bf16 %v3793_v14  ;;  %v3794_v25 = vunpack.i.l.bf16 %v3793_v14 }
 0x5bc   : > { %v3785_v32 = vunpack.i.h.bf16 %v3783_v17  ;;  %v3784_v39 = vunpack.i.l.bf16 %v3783_v17  ;;  %v3408_v17 = vor.u32 %v3555_v48, %v3405_v52 }
 0x5be   : > { %v2330_v29 = vsel %vm1766_vm8, %v2245_v45, %v3784_v39  ;;  %v2331_v38 = vsel %vm1766_vm8, %v2299_v43, %v3785_v32  ;;  %v3437_v45 = vld [vmem:[%s4560_s30 + $0x78] sm:$0xf0]  ;;  %v3557_v43 = vld [vmem:[%s4560_s30 + $0x44] sm:$0xf]  ;;  %v3397_v39 = vld [vmem:[%s4560_s30 + $0x28] sm:$0xf0] }
 0x5bf   : > { %v2333_v35 = vsel %vm2332_vm10, %v2330_v29, %v3789_v16  ;;  %v2334_v22 = vsel %vm2332_vm10, %v2331_v38, %v3790_v27  ;;  %v3440_v23 = vor.u32 %v3563_v30, %v3437_v45  ;;  %v3416_v54 = vor.u32 %v3557_v43, %v3413_v34  ;;  %v3553_v32 = vld [vmem:[%s4560_s30 + $0x24] sm:$0xf]  ;;  %v3552_v29 = vld [vmem:[%s4560_s30 + $0x14] sm:$0xf0] }
 0x5c0   : > { %v2336_v11 = vsel %vm2335_vm11, %v2333_v35, %v3794_v25  ;;  %v2337_v51 = vsel %vm2335_vm11, %v2334_v22, %v3795_v24  ;;  %v3396_v16 = vor.u32 %v3554_v13, %v3395_v56  ;;  %v3400_v24 = vor.u32 %v3553_v32, %v3397_v39  ;;  %v3387_v25 = vld [vmem:[%s4560_s30 + $0x10] sm:$0xf]  ;;  %v3551_v35 = vld [vmem:[%s4560_s30 + $0x14] sm:$0xf]  ;;  %v3389_v22 = vld [vmem:[%s4560_s30 + $0x18] sm:$0xf0] }
 0x5c1   : > { %v2338_v37 = vpack.c.bf16 %v2337_v51, %v2336_v11  ;;  %2592 = vmatpush.bf16.msra.mxu3 %v3440_v23  ;;  %v3388_v11 = vor.u32 %v3552_v29, %v3387_v25  ;;  %v3392_v51 = vor.u32 %v3551_v35, %v3389_v22  ;;  %v3572_v22 = vld [vmem:[%s4568_s3 + $0x38] sm:$0xff] }
 0x5c2   : > { %2583 = vmatpush.bf16.msrb.mxu2 %v3396_v16  ;;  %2916 = vmatpush.bf16.msrb.mxu0 %v3572_v22 }
 0x5c3   : > { %2415 = vmatmul.bf16.vlgmr.msrb.gmra.mxu1 %v2338_v37  ;;  %v3379_v37 = vld [vmem:[%s4560_s30] sm:$0xf] }
 0x5c5   : > { %2593 = vmatpush.bf16.msra.mxu3 %v3432_v10 }
 0x5c6   : > { %2584 = vmatpush.bf16.msrb.mxu2 %v3388_v11  ;;  %v3580_v11 = vld [vmem:[%s4568_s3 + $0x78] sm:$0xff] }
 0x5c7   : > { %2930 = vmatpush.bf16.msra.mxu1 %v3580_v11 }
 0x5c9   : > { %2594 = vmatpush.bf16.msra.mxu3 %v3424_v44 }
 0x5cd   : > { %2595 = vmatpush.bf16.msra.mxu3 %v3416_v54 }
 0x5d1   : > { %2596 = vmatpush.bf16.msra.mxu3 %v3408_v17 }
 0x5d5   : > { %2597 = vmatpush.bf16.msra.mxu3 %v3400_v24 }
 0x5d9   : > { %2598 = vmatpush.bf16.msra.mxu3 %v3392_v51 }
 0x640   : > { %v2416_v55 = vpop.f32.mrf.mxu1 }
 0x641   : > { %v2417_v58 = vadd.f32 %v3798_v5, %v2416_v55  ;;  %v3549_v55 = vld [vmem:[%s4560_s30 + $0x4] sm:$0xf] }
 0x643   : > { %v5256_v62 = vadd.f32 %v3852_v57, %v2417_v58  ;;  %v3381_v58 = vld [vmem:[%s4560_s30 + $0x8] sm:$0xf0] }
 0x645   : > { %2425 = vadd.xlane.f32.xlu1 %v5256_v62 }
 0x648   : > { %v2418_v19 = vpop.f32.mrf.mxu1 }
 0x649   : > { %v2419_v49 = vadd.f32 %v3798_v5, %v2418_v19  ;;  %v3550_v5 = vld [vmem:[%s4560_s30 + $0x4] sm:$0xf0] }
 0x64b   : > { %v5260_v1 = vadd.f32 %v3853_v63, %v2419_v49  ;;  %v3380_v49 = vor.u32 %v3550_v5, %v3379_v37  ;;  %v3384_v63 = vor.u32 %v3549_v55, %v3381_v58 }
 0x64d   : > { %2427 = vadd.xlane.f32.xlu0 %v5260_v1  ;;  %2585 = vmatpush.bf16.msrb.mxu2 %v3380_v49  ;;  %v3571_v49 = vld [vmem:[%s4568_s3 + $0x30] sm:$0xff] }
 0x64e   : > { %2599 = vmatpush.bf16.msra.mxu3 %v3384_v63  ;;  %v3579_v63 = vld [vmem:[%s4568_s3 + $0x70] sm:$0xff]  ;;  %2917 = vmatpush.bf16.msrb.mxu0 %v3571_v49 }
 0x64f   : > { %2931 = vmatpush.bf16.msra.mxu1 %v3579_v63 }
 0x6b8   : > { %v2426_v2 = vpop.xlane.xlu1 %2425 }
 0x6b9   : > { %v2429_v42 = vmul.f32 %v2426_v2, %v4611_v8 }
 0x6bb   : > { %v5265_v47 = vsub.f32 %v5256_v62, %v2429_v42 }
 0x6bd   : > { %v2433_v3 = vmul.f32 %v5265_v47, %v5265_v47 }
 0x6bf   : > { %2435 = vadd.xlane.f32.xlu2 %v2433_v3 }
 0x6c0   : > { %v2428_v4 = vpop.xlane.xlu0 %2427 }
 0x6c1   : > { %v2430_v33 = vmul.f32 %v2428_v4, %v4611_v8 }
 0x6c3   : > { %v5271_v18 = vsub.f32 %v5260_v1, %v2430_v33 }
 0x6c5   : > { %v2434_v60 = vmul.f32 %v5271_v18, %v5271_v18 }
 0x6c7   : > { %2437 = vadd.xlane.f32.xlu1 %v2434_v60 }
 0x732   : > { %v2436_v14 = vpop.xlane.xlu2 %2435 }
 0x733   : > { %v2439_v27 = vmul.f32 %v2436_v14, %v4611_v8 }
 0x735   : > { %v2441_v38 = vadd.f32 1e-05, %v2439_v27 }
 0x737   : > { %3840 = vrsqrt.f32 %v2441_v38  ;;  %vm2449_vm13 = vweird.f32 %v2441_v38 }
 0x73a   : > { %v2438_v57 = vpop.xlane.xlu1 %2437 }
 0x73b   : > { %v2440_v19 = vmul.f32 %v2438_v57, %v4611_v8 }
 0x73d   : > { %v3841_v2 = vpop.eup %3840  ;;  %v2442_v42 = vadd.f32 1e-05, %v2440_v19 }
 0x73e   : > { %v2444_v3 = vmul.f32 %v3841_v2, %v2441_v38  ;;  %vm2450_vm12 = vweird.f32 %v3841_v2 }
 0x73f   : > { %3842 = vrsqrt.f32 %v2442_v42  ;;  %vm2451_vm14 = vmor %vm2449_vm13, %vm2450_vm12  ;;  %vm2459_vm0 = vweird.f32 %v2442_v42 }
 0x740   : > { %v2445_v4 = vmul.f32 %v3841_v2, %v2444_v3 }
 0x742   : > { %v2446_v33 = vmul.f32 0.5, %v2445_v4 }
 0x744   : > { %v2447_v60 = vsub.f32 1.5, %v2446_v33 }
 0x745   : > { %v3843_v50 = vpop.eup %3842 }
 0x746   : > { %v2448_v46 = vmul.f32 %v3841_v2, %v2447_v60  ;;  %v2454_v30 = vmul.f32 %v3843_v50, %v2442_v42  ;;  %vm2460_vm15 = vweird.f32 %v3843_v50 }
 0x747   : > { %vm2461_vm1 = vmor %vm2459_vm0, %vm2460_vm15 }
 0x748   : > { %v2455_v8 = vmul.f32 %v3843_v50, %v2454_v30  ;;  %v2452_v7 = vsel %vm2451_vm14, %v3841_v2, %v2448_v46 }
 0x749   : > { %v2463_v53 = vmul.f32 %v2452_v7, %v5265_v47  ;;  %v2492_v47 = vld [vmem:[%s4562_s23] sm:$0x3]  ;;  %s5603_s23 = sld [smem:[#allocation34_spill]] }
 0x74a   : > { %v2456_v45 = vmul.f32 0.5, %v2455_v8  ;;  %v2494_v44 = vperm.slane %v2492_v47, 0  ;;  %v2495_v40 = vperm.slane %v2492_v47, 1 }
 0x74b   : > { %v2468_v10 = vmul.f32 %v3799_v6, %v2463_v53 }
 0x74c   : > { %v2457_v23 = vsub.f32 1.5, %v2456_v45 }
 0x74d   : > { %v2473_v26 = vadd.f32 %v3800_v12, %v2468_v10 }
 0x74e   : > { %v2458_v9 = vmul.f32 %v3843_v50, %v2457_v23 }
 0x74f   : > { %s3581_s7 = sshll.u32 %s5603_s23, 4 }
 0x750   : > { %v2462_v0 = vsel %vm2461_vm1, %v3843_v50, %v2458_v9  ;;  %v3578_v9 = vld [vmem:[%s4568_s3 + $0x68] sm:$0xff]  ;;  %s2960_s24 = scalar_lea.hbm %s5606_s27, %s3581_s7 }
 0x751   : > { %v2464_v15 = vmul.f32 %v2462_v0, %v5271_v18  ;;  %2932 = vmatpush.bf16.msra.mxu1 %v3578_v9  ;;  %s2963_s14 = sshll.u32 %s2960_s24, 4  ;;  %s2964_s14 = int_to_ptr.hbm [resolvable:$true] %s2963_s14 }
 0x752   : > { %s4132_s15 = sshra.s32 %s2964_s14, 4  ;;  %s4133_s15 = int_to_ptr.hbm [resolvable:$true] %s4132_s15 }
 0x753   : > { %v2469_v36 = vmul.f32 %v3799_v6, %v2464_v15  ;;  %v3570_v6 = vld [vmem:[%s4568_s3 + $0x28] sm:$0xff]  ;;  %s4134_s26 = scalar_lea.hbm %s4133_s15, 16  ;;  %p4139_p5 = scmp.lt.s32.totalorder %s4133_s15, %s5607_s4 }
 0x754   : > { %2918 = vmatpush.bf16.msrb.mxu0 %v3570_v6  ;;  %p4135_p1 = scmp.ne.s32.totalorder %s4133_s15, %s4134_s26  ;;  %p4140_p6 = scmp.lt.s32.totalorder %s4138_s0, %s4134_s26 }
 0x755   : > { %v2474_v41 = vadd.f32 %v3800_v12, %v2469_v36 }
 0x756   : > { %p4136_p4 = pnand %p4135_p1, %p4431_p12  ;;  %p4141_p7 = por %p4140_p6, %p4139_p5 }
 0x757   : > { %v2475_v21 = vpack.c.bf16 %v2474_v41, %v2473_v26 }
 0x758   : > { %p4137_p3 = pneg %p4136_p4 }
 0x759   : > { %2586 = vmatmul.bf16.vlgmr.msrb.gmra.mxu2 %v2475_v21  ;;  %2600 = vmatmul.bf16.vlgmr.msra.gmra.mxu3 %v2475_v21 }
 0x75a   : > { %p4142_p8 = pnand %p4141_p7, %p4137_p3 }
 0x7dc   : > { %v2587_v61 = vpop.f32.mrf.mxu2  ;;  %v2601_v43 = vpop.f32.mrf.mxu3 }
 0x7dd   : > { %v5319_v28 = vadd.f32 %v2587_v61, %v2494_v44  ;;  %v5321_v34 = vadd.f32 %v2601_v43, %v2495_v40  ;;  %v3569_v61 = vld [vmem:[%s4568_s3 + $0x20] sm:$0xff] }
 0x7de   : > { %v3577_v43 = vld [vmem:[%s4568_s3 + $0x60] sm:$0xff]  ;;  %2919 = vmatpush.bf16.msrb.mxu0 %v3569_v61 }
 0x7df   : > { %v5324_v18 = vmul.f32 0.70710677, %v5319_v28  ;;  %v5327_v54 = vmul.f32 0.70710677, %v5321_v34  ;;  %2933 = vmatpush.bf16.msra.mxu1 %v3577_v43 }
 0x7e1   : > { %v2614_v31 = vmul.f32 %v5324_v18, %v5324_v18  ;;  %v2654_v20 = vmul.f32 %v5327_v54, %v5327_v54 }
 0x7e3   : > { %v5333_v48 = vmin.f32 %v2614_v31, 16.0  ;;  %v5335_v59 = vmin.f32 %v2654_v20, 16.0 }
 0x7e4   : > { %v2589_v52 = vpop.f32.mrf.mxu2  ;;  %v2603_v56 = vpop.f32.mrf.mxu3 }
 0x7e5   : > { %v2616_v13 = vmul.f32 2.1237322e-06, %v5333_v48  ;;  %v2627_v14 = vmul.f32 3.8918573e-05, %v5333_v48  ;;  %v5339_v17 = vadd.f32 %v2589_v52, %v2494_v44  ;;  %v2667_v32 = vmul.f32 3.8918573e-05, %v5335_v59 }
 0x7e6   : > { %v5342_v39 = vadd.f32 %v2603_v56, %v2495_v40  ;;  %v2656_v38 = vmul.f32 2.1237322e-06, %v5335_v59 }
 0x7e7   : > { %v2617_v27 = vadd.f32 0.00028619796, %v2616_v13  ;;  %v2628_v16 = vadd.f32 0.001143296, %v2627_v14  ;;  %v2668_v24 = vadd.f32 0.001143296, %v2667_v32 }
 0x7e8   : > { %v5345_v25 = vmul.f32 0.70710677, %v5339_v17  ;;  %v5350_v35 = vmul.f32 0.70710677, %v5342_v39  ;;  %v2657_v42 = vadd.f32 0.00028619796, %v2656_v38 }
 0x7e9   : > { %v2629_v29 = vmul.f32 %v2628_v16, %v5333_v48  ;;  %v2669_v51 = vmul.f32 %v2668_v24, %v5335_v59  ;;  %v2618_v5 = vmul.f32 %v2617_v27, %v5333_v48  ;;  %v3568_v32 = vld [vmem:[%s4568_s3 + $0x18] sm:$0xff] }
 0x7ea   : > { %v2694_v37 = vmul.f32 %v5345_v25, %v5345_v25  ;;  %v2734_v58 = vmul.f32 %v5350_v35, %v5350_v35  ;;  %v2658_v23 = vmul.f32 %v2657_v42, %v5335_v59  ;;  %2920 = vmatpush.bf16.msrb.mxu0 %v3568_v32 }
 0x7eb   : > { %v2630_v55 = vadd.f32 0.014752088, %v2629_v29  ;;  %v2670_v57 = vadd.f32 0.014752088, %v2669_v51  ;;  %v2619_v50 = vadd.f32 0.0036580483, %v2618_v5 }
 0x7ec   : > { %v5360_v19 = vmin.f32 %v2694_v37, 16.0  ;;  %v5365_v3 = vmin.f32 %v2734_v58, 16.0  ;;  %v2659_v44 = vadd.f32 0.0036580483, %v2658_v23  ;;  %v3576_v29 = vld [vmem:[%s4568_s3 + $0x58] sm:$0xff]  ;;  %v3567_v37 = vld [vmem:[%s4568_s3 + $0x10] sm:$0xff] }
 0x7ed   : > { %v2631_v2 = vmul.f32 %v2630_v55, %v5333_v48  ;;  %v2671_v4 = vmul.f32 %v2670_v57, %v5335_v59  ;;  %v2620_v36 = vmul.f32 %v2619_v50, %v5333_v48  ;;  %2934 = vmatpush.bf16.msra.mxu1 %v3576_v29  ;;  %v3575_v5 = vld [vmem:[%s4568_s3 + $0x50] sm:$0xff]  ;;  %v3574_v50 = vld [vmem:[%s4568_s3 + $0x48] sm:$0xff] }
 0x7ee   : > { %v2696_v33 = vmul.f32 2.1237322e-06, %v5360_v19  ;;  %v2707_v60 = vmul.f32 3.8918573e-05, %v5360_v19  ;;  %v2736_v53 = vmul.f32 2.1237322e-06, %v5365_v3  ;;  %v2660_v22 = vmul.f32 %v2659_v44, %v5335_v59  ;;  %2921 = vmatpush.bf16.msrb.mxu0 %v3567_v37 }
 0x7ef   : > { %v2632_v46 = vadd.f32 0.112945676, %v2631_v2  ;;  %v2672_v30 = vadd.f32 0.112945676, %v2671_v4  ;;  %v2747_v12 = vmul.f32 3.8918573e-05, %v5365_v3 }
 0x7f0   : > { %v2697_v8 = vadd.f32 0.00028619796, %v2696_v33  ;;  %v2708_v7 = vadd.f32 0.001143296, %v2707_v60  ;;  %v2737_v52 = vadd.f32 0.00028619796, %v2736_v53 }
 0x7f1   : > { %v2633_v45 = vmul.f32 %v2632_v46, %v5333_v48  ;;  %v2673_v0 = vmul.f32 %v2672_v30, %v5335_v59  ;;  %v2748_v56 = vadd.f32 0.001143296, %v2747_v12  ;;  %v2621_v13 = vadd.f32 0.05243302, %v2620_v36  ;;  %2935 = vmatpush.bf16.msra.mxu1 %v3575_v5  ;;  %v3566_v60 = vld [vmem:[%s4568_s3 + $0x8] sm:$0xff]  ;;  %v3565_v12 = vld [vmem:[%s4568_s3] sm:$0xff] }
 0x7f2   : > { %v2698_v15 = vmul.f32 %v2697_v8, %v5360_v19  ;;  %v2709_v10 = vmul.f32 %v2708_v7, %v5360_v19  ;;  %v2738_v11 = vmul.f32 %v2737_v52, %v5365_v3  ;;  %v2661_v49 = vadd.f32 0.05243302, %v2660_v22  ;;  %2922 = vmatpush.bf16.msrb.mxu0 %v3566_v60  ;;  %v3573_v36 = vld [vmem:[%s4568_s3 + $0x40] sm:$0xff]  ;;  %s5604_s3 = scalar_lea.vmem [#allocation14], %s4534_s5  ;;  %s5609_s5 = sand.u32 1, %s5605_s20  }
 0x7f3   : > { %v2634_v26 = vadd.f32 0.4994258, %v2633_v45  ;;  %v2674_v41 = vadd.f32 0.4994258, %v2673_v0  ;;  %v2749_v24 = vmul.f32 %v2748_v56, %v5365_v3  ;;  %v2622_v51 = vmul.f32 %v2621_v13, %v5333_v48  ;;  %s2949_s17 = scalar_lea.sflag [#allocation4], %s5609_s5 }
 0x7f4   : > { %v2710_v21 = vadd.f32 0.014752088, %v2709_v10  ;;  %v2699_v40 = vadd.f32 0.0036580483, %v2698_v15  ;;  %v2739_v2 = vadd.f32 0.0036580483, %v2738_v11  ;;  %v2662_v6 = vmul.f32 %v2661_v49, %v5335_v59 }
 0x7f5   : > { %v2635_v47 = vmul.f32 %v2634_v26, %v5333_v48  ;;  %v2675_v31 = vmul.f32 %v2674_v41, %v5335_v59  ;;  %v2750_v58 = vadd.f32 0.014752088, %v2749_v24  ;;  %v2623_v33 = vadd.f32 0.18741608, %v2622_v51  ;;  %2936 = vmatpush.bf16.msra.mxu1 %v3574_v50 }
 0x7f6   : > { %v2711_v20 = vmul.f32 %v2710_v21, %v5360_v19  ;;  %v2700_v38 = vmul.f32 %v2699_v40, %v5360_v19  ;;  %v2740_v0 = vmul.f32 %v2739_v2, %v5365_v3  ;;  %v2663_v61 = vadd.f32 0.18741608, %v2662_v6  ;;  %2923 = vmatpush.bf16.msrb.mxu0 %v3565_v12 }
 0x7f7   : > { %v5385_v14 = vadd.f32 1.0, %v2635_v47  ;;  %v5388_v27 = vadd.f32 1.0, %v2675_v31  ;;  %v2751_v42 = vmul.f32 %v2750_v58, %v5365_v3  ;;  %v2624_v15 = vmul.f32 %v2623_v33, %v5333_v48 }
 0x7f8   : > { %v2712_v16 = vadd.f32 0.112945676, %v2711_v20  ;;  %v2701_v57 = vadd.f32 0.05243302, %v2700_v38  ;;  %v2741_v43 = vadd.f32 0.05243302, %v2740_v0 }
 0x7f9   : > { %3844 = vrcp.f32 %v5385_v14  ;;  %v2752_v23 = vadd.f32 0.112945676, %v2751_v42  ;;  %v2648_v40 = vand.u32 2147483648, %v5385_v14  ;;  %v2625_v31 = vadd.f32 1.1283791, %v2624_v15  ;;  %2937 = vmatpush.bf16.msra.mxu1 %v3573_v36 }
 0x7fa   : > { %3846 = vrcp.f32 %v5388_v27  ;;  %v2713_v55 = vmul.f32 %v2712_v16, %v5360_v19  ;;  %v2702_v45 = vmul.f32 %v2701_v57, %v5360_v19  ;;  %vm2642_vm3 = vweird.f32 %v5385_v14 }
 0x7fb   : > { %v2753_v10 = vmul.f32 %v2752_v23, %v5365_v3  ;;  %v2646_v48 = vand.u32 2147483647, %v5385_v14  ;;  %v2649_v24 = vor.u32 1.1754944e-38, %v2648_v40  ;;  %v2742_v29 = vmul.f32 %v2741_v43, %v5365_v3 }
 0x7fc   : > { %v2714_v63 = vadd.f32 0.4994258, %v2713_v55  ;;  %v2703_v21 = vadd.f32 0.18741608, %v2702_v45  ;;  %v2626_v38 = vmul.f32 %v2625_v31, %v5324_v18  ;;  %v2688_v37 = vand.u32 2147483648, %v5388_v27 }
 0x7fd   : > { %v2754_v47 = vadd.f32 0.4994258, %v2753_v10  ;;  %vm2647_vm5 = vcmp.eq.f32.partialorder %v2646_v48, 8.507059e+37  ;;  %vm2682_vm7 = vweird.f32 %v5388_v27  ;;  %v2743_v57 = vadd.f32 0.18741608, %v2742_v29 }
 0x7fe   : > { %v2715_v8 = vmul.f32 %v2714_v63, %v5360_v19  ;;  %v2704_v13 = vmul.f32 %v2703_v21, %v5360_v19  ;;  %v2686_v19 = vand.u32 2147483647, %v5388_v27 }
 0x7ff   : > { %v3845_v4 = vpop.eup %3844  ;;  %v2755_v20 = vmul.f32 %v2754_v47, %v5365_v3 }
 0x800   : > { %v5404_v46 = vpop.eup %3846  ;;  %v2638_v30 = vmul.f32 %v3845_v4, %v5385_v14  ;;  %v2716_v9 = vadd.f32 1.0, %v2715_v8  ;;  %vm2643_vm2 = vweird.f32 %v3845_v4  ;;  %v2664_v14 = vmul.f32 %v2663_v61, %v5335_v59 }
 0x801   : > { %v2678_v7 = vmul.f32 %v5404_v46, %v5388_v27  ;;  %vm2644_vm4 = vmor %vm2642_vm3, %vm2643_vm2  ;;  %v5423_v32 = vadd.f32 1.0, %v2755_v20  ;;  %vm2683_vm6 = vweird.f32 %v5404_v46  ;;  %v2705_v5 = vadd.f32 1.1283791, %v2704_v13 }
 0x802   : > { %v2639_v53 = vsub.f32 1.0, %v2638_v30  ;;  %3848 = vrcp.f32 %v2716_v9  ;;  %v2726_v18 = vand.u32 2147483647, %v2716_v9  ;;  %v2728_v58 = vand.u32 2147483648, %v2716_v9  ;;  %vm5434_vm8 = vmor %vm2682_vm7, %vm2683_vm6 }
 0x803   : > { %v2679_v41 = vsub.f32 1.0, %v2678_v7  ;;  %3850 = vrcp.f32 %v5423_v32  ;;  %v2665_v2 = vadd.f32 1.1283791, %v2664_v14  ;;  %vm2687_vm10 = vcmp.eq.f32.partialorder %v2686_v19, 8.507059e+37 }
 0x804   : > { %v2640_v26 = vmul.f32 %v3845_v4, %v2639_v53  ;;  %vm2722_vm11 = vweird.f32 %v2716_v9  ;;  %v2706_v60 = vmul.f32 %v2705_v5, %v5345_v25  ;;  %vm2727_vm13 = vcmp.eq.f32.partialorder %v2726_v18, 8.507059e+37 }
 0x805   : > { %v2680_v52 = vmul.f32 %v5404_v46, %v2679_v41  ;;  %v2729_v50 = vor.u32 1.1754944e-38, %v2728_v58  ;;  %v2744_v30 = vmul.f32 %v2743_v57, %v5365_v3  ;;  %v2666_v53 = vmul.f32 %v2665_v2, %v5327_v54 }
 0x806   : > { %v2641_v44 = vadd.f32 %v3845_v4, %v2640_v26  ;;  %v2766_v10 = vand.u32 2147483647, %v5423_v32  ;;  %v2768_v25 = vand.u32 2147483648, %v5423_v32  ;;  %v2606_v3 = vmul.f32 0.5, %v5319_v28 }
 0x807   : > { %v2681_v51 = vadd.f32 %v5404_v46, %v2680_v52  ;;  %v2608_v41 = vmul.f32 0.5, %v5339_v17  ;;  %vm2762_vm15 = vweird.f32 %v5423_v32  ;;  %v2609_v13 = vmul.f32 0.5, %v5342_v39 }
 0x808   : > { %v2645_v56 = vsel %vm2644_vm4, %v3845_v4, %v2641_v44  ;;  %v3849_v16 = vpop.eup %3848  ;;  %v2689_v4 = vor.u32 1.1754944e-38, %v2688_v37  ;;  %v2769_v40 = vor.u32 1.1754944e-38, %v2768_v25  ;;  %vm2767_vm1 = vcmp.eq.f32.partialorder %v2766_v10, 8.507059e+37 }
 0x809   : > { %v2718_v22 = vmul.f32 %v3849_v16, %v2716_v9  ;;  %v2650_v11 = vsel %vm2647_vm5, %v2649_v24, %v2645_v56  ;;  %vm2723_vm9 = vweird.f32 %v3849_v16  ;;  %v2685_v42 = vsel %vm5434_vm8, %v5404_v46, %v2681_v51  ;;  %v3851_v27 = vpop.eup %3850 }
 0x80a   : > { %v2651_v59 = vmul.f32 %v2650_v11, %v2626_v38  ;;  %vm2724_vm12 = vmor %vm2722_vm11, %vm2723_vm9  ;;  %v2690_v7 = vsel %vm2687_vm10, %v2689_v4, %v2685_v42  ;;  %v2758_v23 = vmul.f32 %v3851_v27, %v5423_v32  ;;  %v2745_v9 = vadd.f32 1.1283791, %v2744_v30  ;;  %v3801_v38 = vld [vmem:[%s5604_s3] ss:$0 sm:$0xff] }
 0x80b   : > { %v2719_v55 = vsub.f32 1.0, %v2718_v22  ;;  %v2691_v15 = vmul.f32 %v2690_v7, %v2666_v53  ;;  %vm2763_vm14 = vweird.f32 %v3851_v27  ;;  %v2607_v56 = vmul.f32 0.5, %v5321_v34 }
 0x80c   : > { %v3441_v8 = vclamps-f32 %v2651_v59, 1.0  ;;  %v2759_v0 = vsub.f32 1.0, %v2758_v23  ;;  %v2746_v44 = vmul.f32 %v2745_v9, %v5350_v35  ;;  %vm2764_vm0 = vmor %vm2762_vm15, %vm2763_vm14 }
 0x80d   : > { %v2720_v63 = vmul.f32 %v3849_v16, %v2719_v55  ;;  %v3442_v54 = vclamps-f32 %v2691_v15, 1.0 }
 0x80e   : > { %v2774_v12 = vadd.f32 1.0, %v3441_v8  ;;  %v2760_v26 = vmul.f32 %v3851_v27, %v2759_v0 }
 0x80f   : > { %v2721_v33 = vadd.f32 %v3849_v16, %v2720_v63  ;;  %v2775_v28 = vadd.f32 1.0, %v3442_v54 }
 0x810   : > { %v2761_v47 = vadd.f32 %v3851_v27, %v2760_v26  ;;  %v2778_v61 = vmul.f32 %v2774_v12, %v2606_v3 }
 0x811   : > { %v2725_v45 = vsel %vm2724_vm12, %v3849_v16, %v2721_v33  ;;  %v2779_v32 = vmul.f32 %v2775_v28, %v2607_v56 }
 0x812   : > { %v2730_v46 = vsel %vm2727_vm13, %v2729_v50, %v2725_v45  ;;  %v2765_v31 = vsel %vm2764_vm0, %v3851_v27, %v2761_v47 }
 0x813   : > { %v2731_v6 = vmul.f32 %v2730_v46, %v2706_v60  ;;  %v2770_v48 = vsel %vm2767_vm1, %v2769_v40, %v2765_v31 }
 0x814   : > { %v2771_v52 = vmul.f32 %v2770_v48, %v2746_v44 }
 0x815   : > { %v3443_v36 = vclamps-f32 %v2731_v6, 1.0 }
 0x816   : > { %v3444_v17 = vclamps-f32 %v2771_v52, 1.0 }
 0x817   : > { %v2776_v21 = vadd.f32 1.0, %v3443_v36 }
 0x818   : > { %v2777_v35 = vadd.f32 1.0, %v3444_v17 }
 0x819   : > { %v2780_v43 = vmul.f32 %v2776_v21, %v2608_v41 }
 0x81a   : > { %v2781_v16 = vmul.f32 %v2777_v35, %v2609_v13 }
 0x81b   : > { %v2782_v20 = vpack.c.bf16 %v2780_v43, %v2778_v61 }
 0x81c   : > { %v2783_v24 = vpack.c.bf16 %v2781_v16, %v2779_v32 }
 0x81d   : > { %2924 = vmatmul.bf16.vlgmr.msrb.gmra.mxu0 %v2782_v20 }
 0x81e   : > { %2938 = vmatmul.bf16.vlgmr.msra.gmra.mxu1 %v2783_v24 }
 0x89a   : > { %v2925_v29 = vpop.f32.mrf.mxu0 }
 0x89b   : > { %v2926_v14 = vadd.f32 %v3801_v38, %v2925_v29  ;;  %v2939_v22 = vpop.f32.mrf.mxu1 }
 0x89d   : > { %v2940_v11 = vadd.f32 %v2939_v22, %v2926_v14 }
 0x89f   : > { %v2944_v34 = vadd.f32 %v2940_v11, %v5256_v62 }
 0x8a1   : > { %2946 = vst [vmem:[%s4595_s9] sm:$0xff] %v2944_v34 }
 0x8a2   : > { %v2927_v51 = vpop.f32.mrf.mxu0 }
 0x8a3   : > { %v2928_v39 = vadd.f32 %v3801_v38, %v2927_v51  ;;  %v2941_v19 = vpop.f32.mrf.mxu1 }
 0x8a5   : > { %v2942_v37 = vadd.f32 %v2941_v19, %v2928_v39 }
 0x8a7   : > { %v2945_v5 = vadd.f32 %v2942_v37, %v5260_v1 }
 0x8a9   : > { %2947 = vst [vmem:[%s4595_s9 + $0x8] sm:$0xff] %v2945_v5 }
 0x8aa   : > { %4145 = shalt.err (!%p4142_p8)
}
 0x8ab   : > { %s4272_s9 = smov 128   ;;  %s4273_s30 = smov 8  }
 0x8ac   : > { %3601 = dma.vmem_to_hbm [thread:$0]  (%p4431_p12), %s2962_s13, 256, %s2964_s14, %s2949_s17, %s4272_s9, %s4272_s9, %s4273_s30  }
 0x8ad PF: > { %s5610_s18 = sld [smem:[#allocation36_spill]] }
 0x8ae   : > { %s5611_s1 = sld [smem:[#allocation29_spill]] }
 0x8b3   : > { %p3633_p9 = scmp.ge.s32.totalorder %s5610_s18, 2 }
 0x8b4   : > { %s2978_s23 = sand.u32 1, %s5611_s1  }
 0x8b5   : > { %p3629_p10 = pnand %p3633_p9, %p4441_p2  ;;  %s2979_s3 = scalar_lea.sflag [#allocation4], %s2978_s23 }
 0x8b7   : > { %p3630_p11 = pneg %p3629_p10 }
 0x8b9   : > { %4213 = dma.done.wait (%p3630_p11), %s2979_s3, 256  }
 0x8ba   : > { %4215 = vsyncadd (%p3630_p11), %s2979_s3, 4294967040  ;;  %s40_s13 = sadd.s32 1, %s5610_s18   ;;  %s5613_s21 = sld [smem:[#allocation30_spill]] }
 0x8bb   : > { %p37_p13 = scmp.ge.s32.totalorder %s40_s13, 6   ;;  %s5614_s22 = sld [smem:[#allocation31_spill]] }
 0x8bc   : > { %s5615_s23 = sld [smem:[#allocation41_spill]]  ;;  %s5621_s24 = smov %s4234_s25 }
 0x8bd   : > { %s5616_s20 = sld [smem:[#allocation32_spill]]  ;;  %s5623_s27 = smov %s4250_s29 }
 0x8be   : > { %s5617_s26 = sld [smem:[#allocation40_spill]] }
 0x8bf   : > { %s5618_s28 = sld [smem:[#allocation35_spill]] }
 0x8c0   : > { %s5619_s7 = sld [smem:[#allocation38_spill]] }
 0x8c1   : > { %s5620_s30 = sld [smem:[#allocation39_spill]] }
 0x8c2   :  { %39 = sbr.rel (!%p37_p13) target bundleno = 29 (0x1d), region = 213 }
 0x8c3   : > { %s5622_s25 = smov %s5616_s20 }
 0x8c6   : > { %s5624_s29 = smov %s5619_s7 }
 0x8c7   :  { %2985 = vsyncpa [#allocation3], 1 }
 0x8c8   :  { %2987 = vsyncpa [#allocation3 + $0x1], 1 }
 0x8c9   :  { %2988 = vsyncpa [#allocation6], 1 }
 0x8ca   :  { %2990 = vsyncpa [#allocation6 + $0x1], 1 }
 0x8cb   :  { %2991 = vsyncpa [#allocation9], 1 }
 0x8cc   :  { %2993 = vsyncpa [#allocation9 + $0x1], 1 }
 0x8cd   :  { %2994 = vsyncpa [#allocation12], 1 }
 0x8ce   :  { %2996 = vsyncpa [#allocation12 + $0x1], 1 }
 0x8cf   :  { %2997 = vsyncpa [#allocation15], 1 }
 0x8d0   :  { %2999 = vsyncpa [#allocation15 + $0x1], 1 }
 0x8d1   :  { %3000 = vsyncpa [#allocation4], 1 }
 0x8d2   :  { %3002 = vsyncpa [#allocation4 + $0x1], 1 }

</bundles_post_ra>
